<compile_context>
chip_gen: v5e
topology: v5e:2x2
jax: 0.10.0
libtpu: 0.0.40
codegen_flags: <defaults>
</compile_context>

<pallas_src>
import jax
import jax.numpy as jnp
import numpy as np
from jax.experimental import pallas as pl
from jax.experimental.pallas import tpu as pltpu

NUM_CLASSES = 10


# ---------------------------------------------------------------------------
# Fused Pallas kernel: conv (interval affine) -> ReLU -> linear -> objective
# ---------------------------------------------------------------------------
def _deeppoly_fused_kernel(lcol_ref, ucol_ref, wconv_ref, bconv_ref,
                           wlin_ref, blin_ref, d_ref,
                           l1_ref, u1_ref, l2_ref, u2_ref,
                           l3_ref, u3_ref, l4_ref, u4_ref):
    c_out = l1_ref.shape[0]
    n_cls = l3_ref.shape[1]

    # ---- Conv2d as im2col interval-affine, lane-dense (c_out, H*W) output ----
    lcol = lcol_ref[...]                       # (K, HW)
    ucol = ucol_ref[...]
    c0 = 0.5 * (lcol + ucol)
    r0 = 0.5 * (ucol - lcol)
    w = wconv_ref[...]                         # (c_out, K)
    mid1 = jnp.dot(w, c0, preferred_element_type=jnp.float32)            # (c_out, HW)
    rad1 = jnp.dot(jnp.abs(w), r0, preferred_element_type=jnp.float32)
    b1 = bconv_ref[...]                        # (c_out, 1) -> broadcasts over lanes
    l1 = mid1 - rad1 + b1
    u1 = mid1 + rad1 + b1
    l1_ref[...] = l1
    u1_ref[...] = u1

    # ---- ReLU (box relaxation), fused epilogue ----
    # TODO(synk): learnable DeepPoly ReLU slopes (slope_upper / slope_lower)
    # are not implemented; this is the box relaxation l'=relu(l), u'=relu(u).
    l2 = jnp.maximum(l1, 0.0)
    u2 = jnp.maximum(u1, 0.0)
    l2_ref[...] = l2
    u2_ref[...] = u2

    # ---- Linear to NUM_CLASSES, contracted per conv channel ----
    # (c_out, HW) row-major == PyTorch (c_out, H, W) flatten order, so we can
    # contract channel-by-channel without an in-kernel reshape/relayout.
    c2 = 0.5 * (l2 + u2)
    r2 = 0.5 * (u2 - l2)
    mid3 = blin_ref[...]                       # start from bias, (1, n_cls)
    rad3 = jnp.zeros((1, n_cls), jnp.float32)
    for ch in range(c_out):                    # static, fully unrolled (c_out = 8)
        wg = wlin_ref[ch]                      # (HW, n_cls)
        mid3 = mid3 + jnp.dot(c2[ch:ch + 1, :], wg,
                              preferred_element_type=jnp.float32)
        rad3 = rad3 + jnp.dot(r2[ch:ch + 1, :], jnp.abs(wg),
                              preferred_element_type=jnp.float32)
    l3 = mid3 - rad3
    u3 = mid3 + rad3
    l3_ref[...] = l3
    u3_ref[...] = u3

    # ---- Objective: lower/upper bounds of z_true - z_j, j != true_label ----
    c3 = 0.5 * (l3 + u3)
    r3 = 0.5 * (u3 - l3)
    d = d_ref[...]                             # (n_cls, n_cls-1), static +-1/0
    mid4 = jnp.dot(c3, d, preferred_element_type=jnp.float32)
    rad4 = jnp.dot(r3, jnp.abs(d), preferred_element_type=jnp.float32)
    l4_ref[...] = mid4 - rad4
    u4_ref[...] = mid4 + rad4


def _full_spec(shape):
    # Small problem: one full-array block per operand (no tiling needed).
    return pl.BlockSpec(shape, lambda i, nd=len(shape): (0,) * nd)


# ---------------------------------------------------------------------------
# Glue: im2col (pure rearrangement, monotone => preserves bound ordering)
# ---------------------------------------------------------------------------
def im2col_chw(x, kh, kw, pad):
    """x: (C, H, W) -> (C*kh*kw, H*W); K ordering (c, i, j) matches conv_w."""
    C, H, W = x.shape
    xp = jnp.pad(x, ((0, 0), (pad, pad), (pad, pad)))
    cols = []
    for i in range(kh):
        for j in range(kw):
            cols.append(xp[:, i:i + H, j:j + W])
    p = jnp.stack(cols, axis=1)                # (C, kh*kw, H, W)
    return p.reshape(C * kh * kw, H * W)


# ---------------------------------------------------------------------------
# Jitted forward: layout prep + single fused pallas_call
# ---------------------------------------------------------------------------
def _forward_impl(x_min, x_max, conv_w, conv_b, lin_w, lin_b, D):
    C, H, W = x_min.shape
    c_out, _, kh, kw = conv_w.shape
    HW = H * W
    K = C * kh * kw
    n_cls = lin_w.shape[0]
    n_obj = D.shape[1]
    pad = 1

    lcol = im2col_chw(x_min.astype(jnp.float32), kh, kw, pad)      # (K, HW)
    ucol = im2col_chw(x_max.astype(jnp.float32), kh, kw, pad)
    w_conv = conv_w.astype(jnp.float32).reshape(c_out, K)          # (c_out, K)
    b_conv = conv_b.astype(jnp.float32).reshape(c_out, 1)
    # (n_cls, c_out*HW) -> (c_out, HW, n_cls), matching (c_out, H, W) flatten.
    w_lin = lin_w.astype(jnp.float32).reshape(n_cls, c_out, HW).transpose(1, 2, 0)
    b_lin = lin_b.astype(jnp.float32).reshape(1, n_cls)

    f32 = jnp.float32
    outs = pl.pallas_call(
        _deeppoly_fused_kernel,
        grid=(1,),
        in_specs=[
            _full_spec((K, HW)),
            _full_spec((K, HW)),
            _full_spec((c_out, K)),
            _full_spec((c_out, 1)),
            _full_spec((c_out, HW, n_cls)),
            _full_spec((1, n_cls)),
            _full_spec((n_cls, n_obj)),
        ],
        out_specs=[
            _full_spec((c_out, HW)), _full_spec((c_out, HW)),
            _full_spec((c_out, HW)), _full_spec((c_out, HW)),
            _full_spec((1, n_cls)), _full_spec((1, n_cls)),
            _full_spec((1, n_obj)), _full_spec((1, n_obj)),
        ],
        out_shape=[
            jax.ShapeDtypeStruct((c_out, HW), f32), jax.ShapeDtypeStruct((c_out, HW), f32),
            jax.ShapeDtypeStruct((c_out, HW), f32), jax.ShapeDtypeStruct((c_out, HW), f32),
            jax.ShapeDtypeStruct((1, n_cls), f32), jax.ShapeDtypeStruct((1, n_cls), f32),
            jax.ShapeDtypeStruct((1, n_obj), f32), jax.ShapeDtypeStruct((1, n_obj), f32),
        ],
        compiler_params=pltpu.CompilerParams(dimension_semantics=("arbitrary",)),
    )(lcol, ucol, w_conv, b_conv, w_lin, b_lin, D)
    return outs


_forward_jit = jax.jit(_forward_impl)


def _objective_matrix(true_label):
    others = [j for j in range(NUM_CLASSES) if j != true_label]
    D = np.zeros((NUM_CLASSES, len(others)), np.float32)
    D[true_label, :] = 1.0
    for col, j in enumerate(others):
        D[j, col] = -1.0
    return jnp.asarray(D)


# ---------------------------------------------------------------------------
# Model (mirrors deeppoly_conv.Model.forward semantics for conv->ReLU->linear
# followed by the verification Objective layer)
# ---------------------------------------------------------------------------
class DeepPolyModel:
    def __init__(self, params, eps, x, true_label):
        x = jnp.squeeze(x, axis=0)                          # torch: x.squeeze(0)
        self.true_label = int(true_label)
        self.x_min = jnp.maximum(x - eps, 0.0)              # clamp(min=0)
        self.x_max = jnp.minimum(x + eps, 1.0)              # clamp(max=1)
        self.params = params
        self.D = _objective_matrix(self.true_label)         # static constant

    def forward(self):
        p = self.params
        C, H, W = self.x_min.shape
        c_out = p["conv_w"].shape[0]

        l1, u1, l2, u2, l3, u3, l4, u4 = _forward_jit(
            self.x_min, self.x_max,
            p["conv_w"], p["conv_b"], p["lin_w"], p["lin_b"], self.D)

        l_list = [self.x_min, l1.reshape(c_out, H, W), l2.reshape(c_out, H, W),
                  l3[0], l4[0]]
        u_list = [self.x_max, u1.reshape(c_out, H, W), u2.reshape(c_out, H, W),
                  u3[0], u4[0]]

        # TODO(synk): symbolic lower/upper relational expressions (lx, ux, lc,
        # uc, dimension) of full DeepPoly back-substitution are not implemented;
        # the empty lists mirror the reference forward()'s unused slots.
        return l_list, u_list, [], [], [], [], []


# ---------------------------------------------------------------------------
# Pure-JAX reference (for correctness validation only)
# ---------------------------------------------------------------------------
def _ref_forward(x_min, x_max, p, D):
    c_out, _, kh, kw = p["conv_w"].shape
    lcol = im2col_chw(x_min, kh, kw, 1)
    ucol = im2col_chw(x_max, kh, kw, 1)
    c0, r0 = 0.5 * (lcol + ucol), 0.5 * (ucol - lcol)
    wm = p["conv_w"].reshape(c_out, -1)
    mid1 = jnp.dot(wm, c0, precision="highest")
    rad1 = jnp.dot(jnp.abs(wm), r0, precision="highest")
    b1 = p["conv_b"][:, None]
    l1, u1 = mid1 - rad1 + b1, mid1 + rad1 + b1
    l2, u2 = jnp.maximum(l1, 0.0), jnp.maximum(u1, 0.0)
    c2 = (0.5 * (l2 + u2)).reshape(1, -1)
    r2 = (0.5 * (u2 - l2)).reshape(1, -1)
    mid3 = jnp.dot(c2, p["lin_w"].T, precision="highest") + p["lin_b"][None, :]
    rad3 = jnp.dot(r2, jnp.abs(p["lin_w"]).T, precision="highest")
    l3, u3 = mid3 - rad3, mid3 + rad3
    c3, r3 = 0.5 * (l3 + u3), 0.5 * (u3 - l3)
    mid4 = jnp.dot(c3, D, precision="highest")
    rad4 = jnp.dot(r3, jnp.abs(D), precision="highest")
    return l1, u1, l2, u2, l3, u3, mid4 - rad4, mid4 + rad4


# ---------------------------------------------------------------------------
if __name__ == "__main__":
    key = jax.random.PRNGKey(0)
    k1, k2, k3, k4, kx = jax.random.split(key, 5)

    C, H, W = 4, 16, 16
    C_OUT, KH, KW = 8, 3, 3
    eps = 0.05
    true_label = 3

    x = jax.random.uniform(kx, (1, C, H, W), jnp.float32)     # image in [0, 1]
    params = dict(
        conv_w=0.10 * jax.random.normal(k1, (C_OUT, C, KH, KW), jnp.float32),
        conv_b=0.10 * jax.random.normal(k2, (C_OUT,), jnp.float32),
        lin_w=0.05 * jax.random.normal(k3, (NUM_CLASSES, C_OUT * H * W), jnp.float32),
        lin_b=0.10 * jax.random.normal(k4, (NUM_CLASSES,), jnp.float32),
    )

    model = DeepPolyModel(params, eps, x, true_label)
    l, u, *_ = model.forward()
    jax.block_until_ready((l, u))

    # Soundness sanity check: lower <= upper at every propagated layer.
    for ll, uu in zip(l, u):
        assert bool(jnp.all(ll <= uu + 1e-5)), "bound inversion"

    # Numerical check against the pure-JAX reference propagation.
    ref = _ref_forward(model.x_min, model.x_max, params, model.D)
    got = (l[1].reshape(C_OUT, -1), u[1].reshape(C_OUT, -1),
           l[2].reshape(C_OUT, -1), u[2].reshape(C_OUT, -1),
           l[3][None, :], u[3][None, :], l[4][None, :], u[4][None, :])
    for a, b in zip(got, ref):
        assert bool(jnp.allclose(a, b, atol=1e-2, rtol=1e-2)), "mismatch vs reference"

    print("KERNEL_OK")
</pallas_src>

<mosaic_0001>
module attributes {stable_mosaic.version = 11 : i64} {
  func.func @_deeppoly_fused_kernel(%arg0: i32, %arg1: memref<36x256xf32, #tpu.memory_space<vmem>>, %arg2: memref<36x256xf32, #tpu.memory_space<vmem>>, %arg3: memref<8x36xf32, #tpu.memory_space<vmem>>, %arg4: memref<8x1xf32, #tpu.memory_space<vmem>>, %arg5: memref<8x256x10xf32, #tpu.memory_space<vmem>>, %arg6: memref<1x10xf32, #tpu.memory_space<vmem>>, %arg7: memref<10x9xf32, #tpu.memory_space<vmem>>, %arg8: memref<8x256xf32, #tpu.memory_space<vmem>>, %arg9: memref<8x256xf32, #tpu.memory_space<vmem>>, %arg10: memref<8x256xf32, #tpu.memory_space<vmem>>, %arg11: memref<8x256xf32, #tpu.memory_space<vmem>>, %arg12: memref<1x10xf32, #tpu.memory_space<vmem>>, %arg13: memref<1x10xf32, #tpu.memory_space<vmem>>, %arg14: memref<1x9xf32, #tpu.memory_space<vmem>>, %arg15: memref<1x9xf32, #tpu.memory_space<vmem>>) attributes {dimension_semantics = [#tpu.dimension_semantics<arbitrary>], iteration_bounds = array<i64: 1>, scalar_prefetch = 0 : i64, scratch_operands = 0 : i64, tpu.core_type = #tpu.core_type<tc>, window_params = [{pipeline_mode = #tpu.pipeline_mode<synchronous>, transform_indices = @transform_0, window_bounds = array<i64: 36, 256>}, {pipeline_mode = #tpu.pipeline_mode<synchronous>, transform_indices = @transform_1, window_bounds = array<i64: 36, 256>}, {pipeline_mode = #tpu.pipeline_mode<synchronous>, transform_indices = @transform_2, window_bounds = array<i64: 8, 36>}, {pipeline_mode = #tpu.pipeline_mode<synchronous>, transform_indices = @transform_3, window_bounds = array<i64: 8, 1>}, {pipeline_mode = #tpu.pipeline_mode<synchronous>, transform_indices = @transform_4, window_bounds = array<i64: 8, 256, 10>}, {pipeline_mode = #tpu.pipeline_mode<synchronous>, transform_indices = @transform_5, window_bounds = array<i64: 1, 10>}, {pipeline_mode = #tpu.pipeline_mode<synchronous>, transform_indices = @transform_6, window_bounds = array<i64: 10, 9>}, {pipeline_mode = #tpu.pipeline_mode<synchronous>, transform_indices = @transform_7, window_bounds = array<i64: 8, 256>}, {pipeline_mode = #tpu.pipeline_mode<synchronous>, transform_indices = @transform_8, window_bounds = array<i64: 8, 256>}, {pipeline_mode = #tpu.pipeline_mode<synchronous>, transform_indices = @transform_9, window_bounds = array<i64: 8, 256>}, {pipeline_mode = #tpu.pipeline_mode<synchronous>, transform_indices = @transform_10, window_bounds = array<i64: 8, 256>}, {pipeline_mode = #tpu.pipeline_mode<synchronous>, transform_indices = @transform_11, window_bounds = array<i64: 1, 10>}, {pipeline_mode = #tpu.pipeline_mode<synchronous>, transform_indices = @transform_12, window_bounds = array<i64: 1, 10>}, {pipeline_mode = #tpu.pipeline_mode<synchronous>, transform_indices = @transform_13, window_bounds = array<i64: 1, 9>}, {pipeline_mode = #tpu.pipeline_mode<synchronous>, transform_indices = @transform_14, window_bounds = array<i64: 1, 9>}]} {
    %c0 = arith.constant 0 : index
    %c0_0 = arith.constant 0 : index
    %0 = vector.load %arg1[%c0, %c0_0] : memref<36x256xf32, #tpu.memory_space<vmem>>, vector<36x256xf32>
    %c0_1 = arith.constant 0 : index
    %c0_2 = arith.constant 0 : index
    %1 = vector.load %arg2[%c0_1, %c0_2] : memref<36x256xf32, #tpu.memory_space<vmem>>, vector<36x256xf32>
    %2 = arith.addf %0, %1 : vector<36x256xf32>
    %cst = arith.constant 5.000000e-01 : f32
    %3 = vector.broadcast %cst : f32 to vector<36x256xf32>
    %4 = arith.mulf %3, %2 : vector<36x256xf32>
    %5 = arith.subf %1, %0 : vector<36x256xf32>
    %cst_3 = arith.constant 5.000000e-01 : f32
    %6 = vector.broadcast %cst_3 : f32 to vector<36x256xf32>
    %7 = arith.mulf %6, %5 : vector<36x256xf32>
    %c0_4 = arith.constant 0 : index
    %c0_5 = arith.constant 0 : index
    %8 = vector.load %arg3[%c0_4, %c0_5] : memref<8x36xf32, #tpu.memory_space<vmem>>, vector<8x36xf32>
    %cst_6 = arith.constant dense<0.000000e+00> : vector<8x256xf32>
    %9 = tpu.matmul %8, %4, %cst_6 {dimension_numbers = #tpu.dot_dimension_numbers<[1], [0], [0], [1], [0, 0, 1, 1], [], []>} : vector<8x36xf32>, vector<36x256xf32>, vector<8x256xf32> -> vector<8x256xf32>
    %10 = math.absf %8 : vector<8x36xf32>
    %cst_7 = arith.constant dense<0.000000e+00> : vector<8x256xf32>
    %11 = tpu.matmul %10, %7, %cst_7 {dimension_numbers = #tpu.dot_dimension_numbers<[1], [0], [0], [1], [0, 0, 1, 1], [], []>} : vector<8x36xf32>, vector<36x256xf32>, vector<8x256xf32> -> vector<8x256xf32>
    %c0_8 = arith.constant 0 : index
    %c0_9 = arith.constant 0 : index
    %12 = vector.load %arg4[%c0_8, %c0_9] : memref<8x1xf32, #tpu.memory_space<vmem>>, vector<8x1xf32>
    %13 = arith.subf %9, %11 : vector<8x256xf32>
    %14 = vector.broadcast %12 : vector<8x1xf32> to vector<8x256xf32>
    %15 = arith.addf %13, %14 : vector<8x256xf32>
    %16 = arith.addf %9, %11 : vector<8x256xf32>
    %17 = vector.broadcast %12 : vector<8x1xf32> to vector<8x256xf32>
    %18 = arith.addf %16, %17 : vector<8x256xf32>
    %c0_10 = arith.constant 0 : index
    %c0_11 = arith.constant 0 : index
    %19 = vector.load %arg8[%c0_10, %c0_11] : memref<8x256xf32, #tpu.memory_space<vmem>>, vector<8x256xf32>
    tpu.vector_store %arg8[%c0_10, %c0_11], %15 {strides = array<i32>} : memref<8x256xf32, #tpu.memory_space<vmem>>, vector<8x256xf32>,
    %c0_12 = arith.constant 0 : index
    %c0_13 = arith.constant 0 : index
    %20 = vector.load %arg9[%c0_12, %c0_13] : memref<8x256xf32, #tpu.memory_space<vmem>>, vector<8x256xf32>
    tpu.vector_store %arg9[%c0_12, %c0_13], %18 {strides = array<i32>} : memref<8x256xf32, #tpu.memory_space<vmem>>, vector<8x256xf32>,
    %cst_14 = arith.constant 0.000000e+00 : f32
    %21 = vector.broadcast %cst_14 : f32 to vector<8x256xf32>
    %22 = arith.maximumf %15, %21 : vector<8x256xf32>
    %cst_15 = arith.constant 0.000000e+00 : f32
    %23 = vector.broadcast %cst_15 : f32 to vector<8x256xf32>
    %24 = arith.maximumf %18, %23 : vector<8x256xf32>
    %c0_16 = arith.constant 0 : index
    %c0_17 = arith.constant 0 : index
    %25 = vector.load %arg10[%c0_16, %c0_17] : memref<8x256xf32, #tpu.memory_space<vmem>>, vector<8x256xf32>
    tpu.vector_store %arg10[%c0_16, %c0_17], %22 {strides = array<i32>} : memref<8x256xf32, #tpu.memory_space<vmem>>, vector<8x256xf32>,
    %c0_18 = arith.constant 0 : index
    %c0_19 = arith.constant 0 : index
    %26 = vector.load %arg11[%c0_18, %c0_19] : memref<8x256xf32, #tpu.memory_space<vmem>>, vector<8x256xf32>
    tpu.vector_store %arg11[%c0_18, %c0_19], %24 {strides = array<i32>} : memref<8x256xf32, #tpu.memory_space<vmem>>, vector<8x256xf32>,
    %27 = arith.addf %22, %24 : vector<8x256xf32>
    %cst_20 = arith.constant 5.000000e-01 : f32
    %28 = vector.broadcast %cst_20 : f32 to vector<8x256xf32>
    %29 = arith.mulf %28, %27 : vector<8x256xf32>
    %30 = arith.subf %24, %22 : vector<8x256xf32>
    %cst_21 = arith.constant 5.000000e-01 : f32
    %31 = vector.broadcast %cst_21 : f32 to vector<8x256xf32>
    %32 = arith.mulf %31, %30 : vector<8x256xf32>
    %c0_22 = arith.constant 0 : index
    %c0_23 = arith.constant 0 : index
    %33 = vector.load %arg6[%c0_22, %c0_23] : memref<1x10xf32, #tpu.memory_space<vmem>>, vector<1x10xf32>
    %cst_24 = arith.constant 0.000000e+00 : f32
    %34 = vector.broadcast %cst_24 : f32 to vector<1x10xf32>
    %c0_25 = arith.constant 0 : index
    %c0_26 = arith.constant 0 : index
    %c0_27 = arith.constant 0 : index
    %35 = vector.load %arg5[%c0_25, %c0_26, %c0_27] : memref<8x256x10xf32, #tpu.memory_space<vmem>>, vector<1x256x10xf32>
    %36 = vector.shape_cast %35 : vector<1x256x10xf32> to vector<256x10xf32>
    %37 = vector.extract_strided_slice %29 {offsets = [0, 0], sizes = [1, 256], strides = [1, 1]} : vector<8x256xf32> to vector<1x256xf32>
    %cst_28 = arith.constant dense<0.000000e+00> : vector<1x10xf32>
    %38 = tpu.matmul %37, %36, %cst_28 {dimension_numbers = #tpu.dot_dimension_numbers<[1], [0], [0], [1], [0, 0, 1, 1], [], []>} : vector<1x256xf32>, vector<256x10xf32>, vector<1x10xf32> -> vector<1x10xf32>
    %39 = arith.addf %33, %38 : vector<1x10xf32>
    %40 = vector.extract_strided_slice %32 {offsets = [0, 0], sizes = [1, 256], strides = [1, 1]} : vector<8x256xf32> to vector<1x256xf32>
    %41 = math.absf %36 : vector<256x10xf32>
    %cst_29 = arith.constant dense<0.000000e+00> : vector<1x10xf32>
    %42 = tpu.matmul %40, %41, %cst_29 {dimension_numbers = #tpu.dot_dimension_numbers<[1], [0], [0], [1], [0, 0, 1, 1], [], []>} : vector<1x256xf32>, vector<256x10xf32>, vector<1x10xf32> -> vector<1x10xf32>
    %43 = arith.addf %34, %42 : vector<1x10xf32>
    %c1 = arith.constant 1 : index
    %c0_30 = arith.constant 0 : index
    %c0_31 = arith.constant 0 : index
    %44 = vector.load %arg5[%c1, %c0_30, %c0_31] : memref<8x256x10xf32, #tpu.memory_space<vmem>>, vector<1x256x10xf32>
    %45 = vector.shape_cast %44 : vector<1x256x10xf32> to vector<256x10xf32>
    %46 = vector.extract_strided_slice %29 {offsets = [1, 0], sizes = [1, 256], strides = [1, 1]} : vector<8x256xf32> to vector<1x256xf32>
    %cst_32 = arith.constant dense<0.000000e+00> : vector<1x10xf32>
    %47 = tpu.matmul %46, %45, %cst_32 {dimension_numbers = #tpu.dot_dimension_numbers<[1], [0], [0], [1], [0, 0, 1, 1], [], []>} : vector<1x256xf32>, vector<256x10xf32>, vector<1x10xf32> -> vector<1x10xf32>
    %48 = arith.addf %39, %47 : vector<1x10xf32>
    %49 = vector.extract_strided_slice %32 {offsets = [1, 0], sizes = [1, 256], strides = [1, 1]} : vector<8x256xf32> to vector<1x256xf32>
    %50 = math.absf %45 : vector<256x10xf32>
    %cst_33 = arith.constant dense<0.000000e+00> : vector<1x10xf32>
    %51 = tpu.matmul %49, %50, %cst_33 {dimension_numbers = #tpu.dot_dimension_numbers<[1], [0], [0], [1], [0, 0, 1, 1], [], []>} : vector<1x256xf32>, vector<256x10xf32>, vector<1x10xf32> -> vector<1x10xf32>
    %52 = arith.addf %43, %51 : vector<1x10xf32>
    %c2 = arith.constant 2 : index
    %c0_34 = arith.constant 0 : index
    %c0_35 = arith.constant 0 : index
    %53 = vector.load %arg5[%c2, %c0_34, %c0_35] : memref<8x256x10xf32, #tpu.memory_space<vmem>>, vector<1x256x10xf32>
    %54 = vector.shape_cast %53 : vector<1x256x10xf32> to vector<256x10xf32>
    %55 = vector.extract_strided_slice %29 {offsets = [2, 0], sizes = [1, 256], strides = [1, 1]} : vector<8x256xf32> to vector<1x256xf32>
    %cst_36 = arith.constant dense<0.000000e+00> : vector<1x10xf32>
    %56 = tpu.matmul %55, %54, %cst_36 {dimension_numbers = #tpu.dot_dimension_numbers<[1], [0], [0], [1], [0, 0, 1, 1], [], []>} : vector<1x256xf32>, vector<256x10xf32>, vector<1x10xf32> -> vector<1x10xf32>
    %57 = arith.addf %48, %56 : vector<1x10xf32>
    %58 = vector.extract_strided_slice %32 {offsets = [2, 0], sizes = [1, 256], strides = [1, 1]} : vector<8x256xf32> to vector<1x256xf32>
    %59 = math.absf %54 : vector<256x10xf32>
    %cst_37 = arith.constant dense<0.000000e+00> : vector<1x10xf32>
    %60 = tpu.matmul %58, %59, %cst_37 {dimension_numbers = #tpu.dot_dimension_numbers<[1], [0], [0], [1], [0, 0, 1, 1], [], []>} : vector<1x256xf32>, vector<256x10xf32>, vector<1x10xf32> -> vector<1x10xf32>
    %61 = arith.addf %52, %60 : vector<1x10xf32>
    %c3 = arith.constant 3 : index
    %c0_38 = arith.constant 0 : index
    %c0_39 = arith.constant 0 : index
    %62 = vector.load %arg5[%c3, %c0_38, %c0_39] : memref<8x256x10xf32, #tpu.memory_space<vmem>>, vector<1x256x10xf32>
    %63 = vector.shape_cast %62 : vector<1x256x10xf32> to vector<256x10xf32>
    %64 = vector.extract_strided_slice %29 {offsets = [3, 0], sizes = [1, 256], strides = [1, 1]} : vector<8x256xf32> to vector<1x256xf32>
    %cst_40 = arith.constant dense<0.000000e+00> : vector<1x10xf32>
    %65 = tpu.matmul %64, %63, %cst_40 {dimension_numbers = #tpu.dot_dimension_numbers<[1], [0], [0], [1], [0, 0, 1, 1], [], []>} : vector<1x256xf32>, vector<256x10xf32>, vector<1x10xf32> -> vector<1x10xf32>
    %66 = arith.addf %57, %65 : vector<1x10xf32>
    %67 = vector.extract_strided_slice %32 {offsets = [3, 0], sizes = [1, 256], strides = [1, 1]} : vector<8x256xf32> to vector<1x256xf32>
    %68 = math.absf %63 : vector<256x10xf32>
    %cst_41 = arith.constant dense<0.000000e+00> : vector<1x10xf32>
    %69 = tpu.matmul %67, %68, %cst_41 {dimension_numbers = #tpu.dot_dimension_numbers<[1], [0], [0], [1], [0, 0, 1, 1], [], []>} : vector<1x256xf32>, vector<256x10xf32>, vector<1x10xf32> -> vector<1x10xf32>
    %70 = arith.addf %61, %69 : vector<1x10xf32>
    %c4 = arith.constant 4 : index
    %c0_42 = arith.constant 0 : index
    %c0_43 = arith.constant 0 : index
    %71 = vector.load %arg5[%c4, %c0_42, %c0_43] : memref<8x256x10xf32, #tpu.memory_space<vmem>>, vector<1x256x10xf32>
    %72 = vector.shape_cast %71 : vector<1x256x10xf32> to vector<256x10xf32>
    %73 = vector.extract_strided_slice %29 {offsets = [4, 0], sizes = [1, 256], strides = [1, 1]} : vector<8x256xf32> to vector<1x256xf32>
    %cst_44 = arith.constant dense<0.000000e+00> : vector<1x10xf32>
    %74 = tpu.matmul %73, %72, %cst_44 {dimension_numbers = #tpu.dot_dimension_numbers<[1], [0], [0], [1], [0, 0, 1, 1], [], []>} : vector<1x256xf32>, vector<256x10xf32>, vector<1x10xf32> -> vector<1x10xf32>
    %75 = arith.addf %66, %74 : vector<1x10xf32>
    %76 = vector.extract_strided_slice %32 {offsets = [4, 0], sizes = [1, 256], strides = [1, 1]} : vector<8x256xf32> to vector<1x256xf32>
    %77 = math.absf %72 : vector<256x10xf32>
    %cst_45 = arith.constant dense<0.000000e+00> : vector<1x10xf32>
    %78 = tpu.matmul %76, %77, %cst_45 {dimension_numbers = #tpu.dot_dimension_numbers<[1], [0], [0], [1], [0, 0, 1, 1], [], []>} : vector<1x256xf32>, vector<256x10xf32>, vector<1x10xf32> -> vector<1x10xf32>
    %79 = arith.addf %70, %78 : vector<1x10xf32>
    %c5 = arith.constant 5 : index
    %c0_46 = arith.constant 0 : index
    %c0_47 = arith.constant 0 : index
    %80 = vector.load %arg5[%c5, %c0_46, %c0_47] : memref<8x256x10xf32, #tpu.memory_space<vmem>>, vector<1x256x10xf32>
    %81 = vector.shape_cast %80 : vector<1x256x10xf32> to vector<256x10xf32>
    %82 = vector.extract_strided_slice %29 {offsets = [5, 0], sizes = [1, 256], strides = [1, 1]} : vector<8x256xf32> to vector<1x256xf32>
    %cst_48 = arith.constant dense<0.000000e+00> : vector<1x10xf32>
    %83 = tpu.matmul %82, %81, %cst_48 {dimension_numbers = #tpu.dot_dimension_numbers<[1], [0], [0], [1], [0, 0, 1, 1], [], []>} : vector<1x256xf32>, vector<256x10xf32>, vector<1x10xf32> -> vector<1x10xf32>
    %84 = arith.addf %75, %83 : vector<1x10xf32>
    %85 = vector.extract_strided_slice %32 {offsets = [5, 0], sizes = [1, 256], strides = [1, 1]} : vector<8x256xf32> to vector<1x256xf32>
    %86 = math.absf %81 : vector<256x10xf32>
    %cst_49 = arith.constant dense<0.000000e+00> : vector<1x10xf32>
    %87 = tpu.matmul %85, %86, %cst_49 {dimension_numbers = #tpu.dot_dimension_numbers<[1], [0], [0], [1], [0, 0, 1, 1], [], []>} : vector<1x256xf32>, vector<256x10xf32>, vector<1x10xf32> -> vector<1x10xf32>
    %88 = arith.addf %79, %87 : vector<1x10xf32>
    %c6 = arith.constant 6 : index
    %c0_50 = arith.constant 0 : index
    %c0_51 = arith.constant 0 : index
    %89 = vector.load %arg5[%c6, %c0_50, %c0_51] : memref<8x256x10xf32, #tpu.memory_space<vmem>>, vector<1x256x10xf32>
    %90 = vector.shape_cast %89 : vector<1x256x10xf32> to vector<256x10xf32>
    %91 = vector.extract_strided_slice %29 {offsets = [6, 0], sizes = [1, 256], strides = [1, 1]} : vector<8x256xf32> to vector<1x256xf32>
    %cst_52 = arith.constant dense<0.000000e+00> : vector<1x10xf32>
    %92 = tpu.matmul %91, %90, %cst_52 {dimension_numbers = #tpu.dot_dimension_numbers<[1], [0], [0], [1], [0, 0, 1, 1], [], []>} : vector<1x256xf32>, vector<256x10xf32>, vector<1x10xf32> -> vector<1x10xf32>
    %93 = arith.addf %84, %92 : vector<1x10xf32>
    %94 = vector.extract_strided_slice %32 {offsets = [6, 0], sizes = [1, 256], strides = [1, 1]} : vector<8x256xf32> to vector<1x256xf32>
    %95 = math.absf %90 : vector<256x10xf32>
    %cst_53 = arith.constant dense<0.000000e+00> : vector<1x10xf32>
    %96 = tpu.matmul %94, %95, %cst_53 {dimension_numbers = #tpu.dot_dimension_numbers<[1], [0], [0], [1], [0, 0, 1, 1], [], []>} : vector<1x256xf32>, vector<256x10xf32>, vector<1x10xf32> -> vector<1x10xf32>
    %97 = arith.addf %88, %96 : vector<1x10xf32>
    %c7 = arith.constant 7 : index
    %c0_54 = arith.constant 0 : index
    %c0_55 = arith.constant 0 : index
    %98 = vector.load %arg5[%c7, %c0_54, %c0_55] : memref<8x256x10xf32, #tpu.memory_space<vmem>>, vector<1x256x10xf32>
    %99 = vector.shape_cast %98 : vector<1x256x10xf32> to vector<256x10xf32>
    %100 = vector.extract_strided_slice %29 {offsets = [7, 0], sizes = [1, 256], strides = [1, 1]} : vector<8x256xf32> to vector<1x256xf32>
    %cst_56 = arith.constant dense<0.000000e+00> : vector<1x10xf32>
    %101 = tpu.matmul %100, %99, %cst_56 {dimension_numbers = #tpu.dot_dimension_numbers<[1], [0], [0], [1], [0, 0, 1, 1], [], []>} : vector<1x256xf32>, vector<256x10xf32>, vector<1x10xf32> -> vector<1x10xf32>
    %102 = arith.addf %93, %101 : vector<1x10xf32>
    %103 = vector.extract_strided_slice %32 {offsets = [7, 0], sizes = [1, 256], strides = [1, 1]} : vector<8x256xf32> to vector<1x256xf32>
    %104 = math.absf %99 : vector<256x10xf32>
    %cst_57 = arith.constant dense<0.000000e+00> : vector<1x10xf32>
    %105 = tpu.matmul %103, %104, %cst_57 {dimension_numbers = #tpu.dot_dimension_numbers<[1], [0], [0], [1], [0, 0, 1, 1], [], []>} : vector<1x256xf32>, vector<256x10xf32>, vector<1x10xf32> -> vector<1x10xf32>
    %106 = arith.addf %97, %105 : vector<1x10xf32>
    %107 = arith.subf %102, %106 : vector<1x10xf32>
    %108 = arith.addf %102, %106 : vector<1x10xf32>
    %c0_58 = arith.constant 0 : index
    %c0_59 = arith.constant 0 : index
    %109 = vector.load %arg12[%c0_58, %c0_59] : memref<1x10xf32, #tpu.memory_space<vmem>>, vector<1x10xf32>
    tpu.vector_store %arg12[%c0_58, %c0_59], %107 {strides = array<i32>} : memref<1x10xf32, #tpu.memory_space<vmem>>, vector<1x10xf32>,
    %c0_60 = arith.constant 0 : index
    %c0_61 = arith.constant 0 : index
    %110 = vector.load %arg13[%c0_60, %c0_61] : memref<1x10xf32, #tpu.memory_space<vmem>>, vector<1x10xf32>
    tpu.vector_store %arg13[%c0_60, %c0_61], %108 {strides = array<i32>} : memref<1x10xf32, #tpu.memory_space<vmem>>, vector<1x10xf32>,
    %111 = arith.addf %107, %108 : vector<1x10xf32>
    %cst_62 = arith.constant 5.000000e-01 : f32
    %112 = vector.broadcast %cst_62 : f32 to vector<1x10xf32>
    %113 = arith.mulf %112, %111 : vector<1x10xf32>
    %114 = arith.subf %108, %107 : vector<1x10xf32>
    %cst_63 = arith.constant 5.000000e-01 : f32
    %115 = vector.broadcast %cst_63 : f32 to vector<1x10xf32>
    %116 = arith.mulf %115, %114 : vector<1x10xf32>
    %c0_64 = arith.constant 0 : index
    %c0_65 = arith.constant 0 : index
    %117 = vector.load %arg7[%c0_64, %c0_65] : memref<10x9xf32, #tpu.memory_space<vmem>>, vector<10x9xf32>
    %cst_66 = arith.constant dense<0.000000e+00> : vector<1x9xf32>
    %118 = tpu.matmul %113, %117, %cst_66 {dimension_numbers = #tpu.dot_dimension_numbers<[1], [0], [0], [1], [0, 0, 1, 1], [], []>} : vector<1x10xf32>, vector<10x9xf32>, vector<1x9xf32> -> vector<1x9xf32>
    %119 = math.absf %117 : vector<10x9xf32>
    %cst_67 = arith.constant dense<0.000000e+00> : vector<1x9xf32>
    %120 = tpu.matmul %116, %119, %cst_67 {dimension_numbers = #tpu.dot_dimension_numbers<[1], [0], [0], [1], [0, 0, 1, 1], [], []>} : vector<1x10xf32>, vector<10x9xf32>, vector<1x9xf32> -> vector<1x9xf32>
    %121 = arith.subf %118, %120 : vector<1x9xf32>
    %c0_68 = arith.constant 0 : index
    %c0_69 = arith.constant 0 : index
    %122 = vector.load %arg14[%c0_68, %c0_69] : memref<1x9xf32, #tpu.memory_space<vmem>>, vector<1x9xf32>
    tpu.vector_store %arg14[%c0_68, %c0_69], %121 {strides = array<i32>} : memref<1x9xf32, #tpu.memory_space<vmem>>, vector<1x9xf32>,
    %123 = arith.addf %118, %120 : vector<1x9xf32>
    %c0_70 = arith.constant 0 : index
    %c0_71 = arith.constant 0 : index
    %124 = vector.load %arg15[%c0_70, %c0_71] : memref<1x9xf32, #tpu.memory_space<vmem>>, vector<1x9xf32>
    tpu.vector_store %arg15[%c0_70, %c0_71], %123 {strides = array<i32>} : memref<1x9xf32, #tpu.memory_space<vmem>>, vector<1x9xf32>,
    return
  }
  func.func @transform_0(%arg0: i32) -> (i32, i32) {
    %c0_i32 = arith.constant 0 : i32
    %c0_i32_0 = arith.constant 0 : i32
    %c0_i32_1 = arith.constant 0 : i32
    return %c0_i32, %c0_i32_0 : i32, i32
  }
  func.func @transform_1(%arg0: i32) -> (i32, i32) {
    %c0_i32 = arith.constant 0 : i32
    %c0_i32_0 = arith.constant 0 : i32
    %c0_i32_1 = arith.constant 0 : i32
    return %c0_i32, %c0_i32_0 : i32, i32
  }
  func.func @transform_2(%arg0: i32) -> (i32, i32) {
    %c0_i32 = arith.constant 0 : i32
    %c0_i32_0 = arith.constant 0 : i32
    %c0_i32_1 = arith.constant 0 : i32
    return %c0_i32, %c0_i32_0 : i32, i32
  }
  func.func @transform_3(%arg0: i32) -> (i32, i32) {
    %c0_i32 = arith.constant 0 : i32
    %c0_i32_0 = arith.constant 0 : i32
    %c0_i32_1 = arith.constant 0 : i32
    return %c0_i32, %c0_i32_0 : i32, i32
  }
  func.func @transform_4(%arg0: i32) -> (i32, i32, i32) {
    %c0_i32 = arith.constant 0 : i32
    %c0_i32_0 = arith.constant 0 : i32
    %c0_i32_1 = arith.constant 0 : i32
    %c0_i32_2 = arith.constant 0 : i32
    return %c0_i32, %c0_i32_0, %c0_i32_1 : i32, i32, i32
  }
  func.func @transform_5(%arg0: i32) -> (i32, i32) {
    %c0_i32 = arith.constant 0 : i32
    %c0_i32_0 = arith.constant 0 : i32
    %c0_i32_1 = arith.constant 0 : i32
    return %c0_i32, %c0_i32_0 : i32, i32
  }
  func.func @transform_6(%arg0: i32) -> (i32, i32) {
    %c0_i32 = arith.constant 0 : i32
    %c0_i32_0 = arith.constant 0 : i32
    %c0_i32_1 = arith.constant 0 : i32
    return %c0_i32, %c0_i32_0 : i32, i32
  }
  func.func @transform_7(%arg0: i32) -> (i32, i32) {
    %c0_i32 = arith.constant 0 : i32
    %c0_i32_0 = arith.constant 0 : i32
    %c0_i32_1 = arith.constant 0 : i32
    return %c0_i32, %c0_i32_0 : i32, i32
  }
  func.func @transform_8(%arg0: i32) -> (i32, i32) {
    %c0_i32 = arith.constant 0 : i32
    %c0_i32_0 = arith.constant 0 : i32
    %c0_i32_1 = arith.constant 0 : i32
    return %c0_i32, %c0_i32_0 : i32, i32
  }
  func.func @transform_9(%arg0: i32) -> (i32, i32) {
    %c0_i32 = arith.constant 0 : i32
    %c0_i32_0 = arith.constant 0 : i32
    %c0_i32_1 = arith.constant 0 : i32
    return %c0_i32, %c0_i32_0 : i32, i32
  }
  func.func @transform_10(%arg0: i32) -> (i32, i32) {
    %c0_i32 = arith.constant 0 : i32
    %c0_i32_0 = arith.constant 0 : i32
    %c0_i32_1 = arith.constant 0 : i32
    return %c0_i32, %c0_i32_0 : i32, i32
  }
  func.func @transform_11(%arg0: i32) -> (i32, i32) {
    %c0_i32 = arith.constant 0 : i32
    %c0_i32_0 = arith.constant 0 : i32
    %c0_i32_1 = arith.constant 0 : i32
    return %c0_i32, %c0_i32_0 : i32, i32
  }
  func.func @transform_12(%arg0: i32) -> (i32, i32) {
    %c0_i32 = arith.constant 0 : i32
    %c0_i32_0 = arith.constant 0 : i32
    %c0_i32_1 = arith.constant 0 : i32
    return %c0_i32, %c0_i32_0 : i32, i32
  }
  func.func @transform_13(%arg0: i32) -> (i32, i32) {
    %c0_i32 = arith.constant 0 : i32
    %c0_i32_0 = arith.constant 0 : i32
    %c0_i32_1 = arith.constant 0 : i32
    return %c0_i32, %c0_i32_0 : i32, i32
  }
  func.func @transform_14(%arg0: i32) -> (i32, i32) {
    %c0_i32 = arith.constant 0 : i32
    %c0_i32_0 = arith.constant 0 : i32
    %c0_i32_1 = arith.constant 0 : i32
    return %c0_i32, %c0_i32_0 : i32, i32
  }
}

</mosaic_0001>

<bundles_post_ra>
// kernel: _forward_impl.1
= control target key start
LH: loop header
LB: loop body
LE: loop exit
PB: predicated region body
PF: predicated region fallthrough
CT: control target
= control target key end

     0   :  { %20 = vsyncpa [#allocation3], 0  ;;  %s3369_s0 = inlined_call_operand.vmem [shape: f32[36,256], index: 0, kind: input, shape index: {}]   ;;  %s3370_s1 = inlined_call_operand.vmem [shape: f32[36,256], index: 1, kind: input, shape index: {}]   ;;  %s3371_s2 = inlined_call_operand.vmem [shape: f32[8,36], index: 2, kind: input, shape index: {}]   ;;  %s3372_s3 = inlined_call_operand.vmem [shape: f32[8,1], index: 3, kind: input, shape index: {}]   ;;  %s3373_s4 = inlined_call_operand.vmem [shape: f32[8,256,10], index: 4, kind: input, shape index: {}]   ;;  %s3374_s5 = inlined_call_operand.vmem [shape: f32[1,10], index: 5, kind: input, shape index: {}]   ;;  %s3375_s6 = inlined_call_operand.vmem [shape: f32[10,9], index: 6, kind: input, shape index: {}]   ;;  %s3376_s7 = inlined_call_operand.hbm [shape: f32[8,256], index: 7, kind: output, shape index: {0}]   ;;  %s3377_s8 = inlined_call_operand.hbm [shape: f32[8,256], index: 8, kind: output, shape index: {1}]   ;;  %s3378_s9 = inlined_call_operand.hbm [shape: f32[8,256], index: 9, kind: output, shape index: {2}]   ;;  %s3379_s10 = inlined_call_operand.hbm [shape: f32[8,256], index: 10, kind: output, shape index: {3}]   ;;  %s3380_s11 = inlined_call_operand.hbm [shape: f32[1,10], index: 11, kind: output, shape index: {4}]   ;;  %s3381_s12 = inlined_call_operand.hbm [shape: f32[1,10], index: 12, kind: output, shape index: {5}]   ;;  %s3382_s13 = inlined_call_operand.hbm [shape: f32[1,9], index: 13, kind: output, shape index: {6}]   ;;  %s3383_s14 = inlined_call_operand.hbm [shape: f32[1,9], index: 14, kind: output, shape index: {7}]  }
   0x1   :  { %21 = vsyncpa [#allocation5], 0 }
   0x2   :  { %22 = vsyncpa [#allocation8], 0 }
   0x3   :  { %23 = vsyncpa [#allocation11], 0  ;;  %v47_v0 = vld [vmem:[%s3369_s0 + $0x40] sm:$0xf]  ;;  %v45_v2 = vld [vmem:[%s3369_s0 + $0x30] sm:$0xff]  ;;  %vm104_vm0 = vcmask 1043456  }
   0x4   :  { %v57_v1 = vld [vmem:[%s3370_s1 + $0x40] sm:$0xf]  ;;  %v48_v4 = vld [vmem:[%s3369_s0 + $0x48] sm:$0xf]  ;;  %v55_v6 = vld [vmem:[%s3370_s1 + $0x30] sm:$0xff]  ;;  %vm100_vm1 = vcmask 293888  }
   0x5   :  { %v87_v3 = vsub.f32 %v57_v1, %v47_v0  ;;  %v58_v5 = vld [vmem:[%s3370_s1 + $0x48] sm:$0xf]  ;;  %v67_v7 = vadd.f32 %v57_v1, %v47_v0  ;;  %v85_v9 = vsub.f32 %v55_v6, %v45_v2  ;;  %v46_v10 = vld [vmem:[%s3369_s0 + $0x38] sm:$0xff]  ;;  %v43_v12 = vld [vmem:[%s3369_s0 + $0x20] sm:$0xff]  ;;  %v65_v14 = vadd.f32 %v55_v6, %v45_v2 }
   0x6   :  { %v88_v8 = vsub.f32 %v58_v5, %v48_v4  ;;  %v56_v11 = vld [vmem:[%s3370_s1 + $0x38] sm:$0xff]  ;;  %v68_v13 = vadd.f32 %v58_v5, %v48_v4  ;;  %v53_v17 = vld [vmem:[%s3370_s1 + $0x20] sm:$0xff]  ;;  %v44_v18 = vld [vmem:[%s3369_s0 + $0x28] sm:$0xff]  ;;  %v2114_v63 = vmov 0  }
   0x7   :  { %v97_v15 = vmul.f32 0.5, %v87_v3  ;;  %v86_v16 = vsub.f32 %v56_v11, %v46_v10  ;;  %v54_v19 = vld [vmem:[%s3370_s1 + $0x28] sm:$0xff]  ;;  %v77_v20 = vmul.f32 0.5, %v67_v7  ;;  %v66_v21 = vadd.f32 %v56_v11, %v46_v10  ;;  %v41_v26 = vld [vmem:[%s3369_s0 + $0x10] sm:$0xff]  ;;  %v42_v28 = vld [vmem:[%s3369_s0 + $0x18] sm:$0xff]  ;;  %1911 = vset.pattern.permute.xlu0 %v2114_v63 }
   0x8   :  { %v98_v22 = vmul.f32 0.5, %v88_v8  ;;  %v95_v23 = vmul.f32 0.5, %v85_v9  ;;  %v83_v24 = vsub.f32 %v53_v17, %v43_v12  ;;  %v84_v25 = vsub.f32 %v54_v19, %v44_v18  ;;  %v51_v27 = vld [vmem:[%s3370_s1 + $0x10] sm:$0xff]  ;;  %v52_v32 = vld [vmem:[%s3370_s1 + $0x18] sm:$0xff]  ;;  %v39_v34 = vld [vmem:[%s3369_s0] sm:$0xff] }
   0x9   :  { %1670 = vmatpush.msk.msra.mxu2 %vm104_vm0, %v97_v15  ;;  %v96_v29 = vmul.f32 0.5, %v86_v16  ;;  %1666 = vmatpush.msk.msra.mxu0 %vm104_vm0, %v77_v20  ;;  %v78_v30 = vmul.f32 0.5, %v68_v13  ;;  %v81_v31 = vsub.f32 %v51_v27, %v41_v26  ;;  %v75_v33 = vmul.f32 0.5, %v65_v14  ;;  %v49_v35 = vld [vmem:[%s3370_s1] sm:$0xff]  ;;  %v40_v40 = vld [vmem:[%s3369_s0 + $0x8] sm:$0xff]  ;;  %v2273_v0 = vld [vmem:[%s3373_s4 + $0x78] sm:$0xff] }
   0xa   :  { %1672 = vmatpush.msk.msra.mxu3 %vm104_vm0, %v98_v22  ;;  %v93_v36 = vmul.f32 0.5, %v83_v24  ;;  %v94_v37 = vmul.f32 0.5, %v84_v25  ;;  %v82_v38 = vsub.f32 %v52_v32, %v42_v28  ;;  %v76_v39 = vmul.f32 0.5, %v66_v21  ;;  %v50_v41 = vld [vmem:[%s3370_s1 + $0x8] sm:$0xff]  ;;  %v99_v42 = vld [vmem:[%s3371_s2] sm:$0xff]  ;;  %v2278_v1 = vld [vmem:[%s3373_s4 + $0xf8] sm:$0xff] }
   0xb   :  { %173 = vmatpush.msra.mxu2 %v95_v23  ;;  %1668 = vmatpush.msk.msra.mxu1 %vm104_vm0, %v78_v30  ;;  %v91_v43 = vmul.f32 0.5, %v81_v31  ;;  %v79_v44 = vsub.f32 %v49_v35, %v39_v34  ;;  %v80_v45 = vsub.f32 %v50_v41, %v40_v40  ;;  %v63_v47 = vadd.f32 %v53_v17, %v43_v12  ;;  %v201_v62 = vld [vmem:[%s3372_s3] sm:$0xff]  ;;  %v2283_v2 = vld [vmem:[%s3373_s4 + $0x178] sm:$0xff]  ;;  %v2289_v3 = vld [vmem:[%s3373_s4 + $0x70] sm:$0xff] }
   0xc   :  { %193 = vmatpush.msra.mxu3 %v96_v29  ;;  %v92_v46 = vmul.f32 0.5, %v82_v38  ;;  %123 = vmatpush.msra.mxu0 %v75_v33  ;;  %v64_v48 = vadd.f32 %v54_v19, %v44_v18  ;;  %v61_v49 = vadd.f32 %v51_v27, %v41_v26  ;;  %v151_v51 = vand.u32 2147483647, %v99_v42  ;;  %v2294_v4 = vld [vmem:[%s3373_s4 + $0x1f8] sm:$0xff]  ;;  %v2301_v5 = vld [vmem:[%s3373_s4 + $0xf0] sm:$0xff]  ;;  %v2313_v7 = vld [vmem:[%s3373_s4 + $0x68] sm:$0xff] }
   0xd   :  { %174 = vmatpush.msra.mxu2 %v93_v36  ;;  %143 = vmatpush.msra.mxu1 %v76_v39  ;;  %v89_v50 = vmul.f32 0.5, %v79_v44  ;;  %v62_v52 = vadd.f32 %v52_v32, %v42_v28  ;;  %v59_v53 = vadd.f32 %v49_v35, %v39_v34  ;;  %v90_v54 = vmul.f32 0.5, %v80_v45  ;;  %v2306_v6 = vld [vmem:[%s3373_s4 + $0x170] sm:$0xff]  ;;  %v2325_v9 = vld [vmem:[%s3373_s4 + $0xe8] sm:$0xff]  ;;  %v2337_v11 = vld [vmem:[%s3373_s4 + $0x60] sm:$0xff] }
   0xe   :  { %194 = vmatpush.msra.mxu3 %v94_v37  ;;  %v73_v55 = vmul.f32 0.5, %v63_v47  ;;  %v74_v56 = vmul.f32 0.5, %v64_v48  ;;  %v60_v57 = vadd.f32 %v50_v41, %v40_v40  ;;  %v71_v58 = vmul.f32 0.5, %v61_v49  ;;  %206 = vperm.xlu0 %1911, %v201_v62   ;;  %v2318_v8 = vld [vmem:[%s3373_s4 + $0x1f0] sm:$0xff]  ;;  %v2330_v10 = vld [vmem:[%s3373_s4 + $0x168] sm:$0xff]  ;;  %v2349_v13 = vld [vmem:[%s3373_s4 + $0xe0] sm:$0xff] }
   0xf   :  { %175 = vmatpush.msra.mxu2 %v91_v43  ;;  %v72_v59 = vmul.f32 0.5, %v62_v52  ;;  %v69_v60 = vmul.f32 0.5, %v59_v53  ;;  %v2342_v12 = vld [vmem:[%s3373_s4 + $0x1e8] sm:$0xff]  ;;  %v2354_v14 = vld [vmem:[%s3373_s4 + $0x160] sm:$0xff]  ;;  %v2361_v15 = vld [vmem:[%s3373_s4 + $0x58] sm:$0xff] }
  0x10   :  { %195 = vmatpush.msra.mxu3 %v92_v46  ;;  %124 = vmatpush.msra.mxu0 %v73_v55  ;;  %v70_v61 = vmul.f32 0.5, %v60_v57  ;;  %v2366_v16 = vld [vmem:[%s3373_s4 + $0x1e0] sm:$0xff]  ;;  %v2373_v17 = vld [vmem:[%s3373_s4 + $0xd8] sm:$0xff]  ;;  %v2385_v19 = vld [vmem:[%s3373_s4 + $0x50] sm:$0xff]  ;;  %v435_v63 = vand.u32 2147483647, %v2306_v6 }
  0x11   :  { %176 = vmatpush.msra.mxu2 %v89_v50  ;;  %144 = vmatpush.msra.mxu1 %v74_v56  ;;  %v2378_v18 = vld [vmem:[%s3373_s4 + $0x158] sm:$0xff]  ;;  %v2397_v21 = vld [vmem:[%s3373_s4 + $0xd0] sm:$0xff]  ;;  %v2409_v23 = vld [vmem:[%s3373_s4 + $0x48] sm:$0xff] }
  0x12   :  { %196 = vmatpush.msra.mxu3 %v90_v54  ;;  %1671 = vmatmul.msk.f32.vlgmr.msra.gmra.mxu2 %vm100_vm1, %v151_v51  ;;  %v2390_v20 = vld [vmem:[%s3373_s4 + $0x1d8] sm:$0xff]  ;;  %v2402_v22 = vld [vmem:[%s3373_s4 + $0x150] sm:$0xff]  ;;  %v2421_v25 = vld [vmem:[%s3373_s4 + $0xc8] sm:$0xff] }
  0x13   :  { %1673 = vmatmul.msk.f32.vlgmr.msra.gmra.mxu3 %vm100_vm1, %v151_v51  ;;  %125 = vmatpush.msra.mxu0 %v71_v58  ;;  %v2414_v24 = vld [vmem:[%s3373_s4 + $0x1d0] sm:$0xff]  ;;  %v2426_v26 = vld [vmem:[%s3373_s4 + $0x148] sm:$0xff]  ;;  %v2433_v27 = vld [vmem:[%s3373_s4 + $0x40] sm:$0xff]  ;;  %v436_v58 = vand.u32 2147483647, %v2283_v2 }
  0x14   :  { %145 = vmatpush.msra.mxu1 %v72_v59  ;;  %380 = vmatpush.msrb.mxu2 %v2283_v2  ;;  %v2438_v28 = vld [vmem:[%s3373_s4 + $0x1c8] sm:$0xff]  ;;  %v2445_v29 = vld [vmem:[%s3373_s4 + $0xc0] sm:$0xff]  ;;  %v2457_v31 = vld [vmem:[%s3373_s4 + $0x38] sm:$0xff] }
  0x15   :  { %126 = vmatpush.msra.mxu0 %v69_v60  ;;  %400 = vmatpush.msrb.mxu3 %v2294_v4  ;;  %v2450_v30 = vld [vmem:[%s3373_s4 + $0x140] sm:$0xff]  ;;  %v2469_v33 = vld [vmem:[%s3373_s4 + $0xb8] sm:$0xff]  ;;  %v2481_v35 = vld [vmem:[%s3373_s4 + $0x30] sm:$0xff] }
  0x16   :  { %146 = vmatpush.msra.mxu1 %v70_v61  ;;  %1667 = vmatmul.msk.f32.vlgmr.msra.gmra.mxu0 %vm100_vm1, %v99_v42  ;;  %v2462_v32 = vld [vmem:[%s3373_s4 + $0x1c0] sm:$0xff]  ;;  %v2474_v34 = vld [vmem:[%s3373_s4 + $0x138] sm:$0xff]  ;;  %v2493_v37 = vld [vmem:[%s3373_s4 + $0xb0] sm:$0xff]  ;;  %v452_v61 = vand.u32 2147483647, %v2294_v4 }
  0x17   :  { %1669 = vmatmul.msk.f32.vlgmr.msra.gmra.mxu1 %vm100_vm1, %v99_v42  ;;  %268 = vmatpush.msrb.mxu0 %v2273_v0  ;;  %v2486_v36 = vld [vmem:[%s3373_s4 + $0x1b8] sm:$0xff]  ;;  %v2498_v38 = vld [vmem:[%s3373_s4 + $0x130] sm:$0xff]  ;;  %v2505_v39 = vld [vmem:[%s3373_s4 + $0x28] sm:$0xff] }
  0x18   :  { %288 = vmatpush.msrb.mxu1 %v2278_v1  ;;  %381 = vmatpush.msrb.mxu2 %v2306_v6  ;;  %v2510_v40 = vld [vmem:[%s3373_s4 + $0x1b0] sm:$0xff]  ;;  %v2517_v41 = vld [vmem:[%s3373_s4 + $0xa8] sm:$0xff]  ;;  %v2529_v43 = vld [vmem:[%s3373_s4 + $0x20] sm:$0xff] }
  0x19   :  { %269 = vmatpush.msrb.mxu0 %v2289_v3  ;;  %401 = vmatpush.msrb.mxu3 %v2318_v8  ;;  %v2522_v42 = vld [vmem:[%s3373_s4 + $0x128] sm:$0xff]  ;;  %v2541_v45 = vld [vmem:[%s3373_s4 + $0xa0] sm:$0xff]  ;;  %v2553_v47 = vld [vmem:[%s3373_s4 + $0x18] sm:$0xff] }
  0x1a   :  { %289 = vmatpush.msrb.mxu1 %v2301_v5  ;;  %382 = vmatpush.msrb.mxu2 %v2330_v10  ;;  %v2534_v44 = vld [vmem:[%s3373_s4 + $0x1a8] sm:$0xff]  ;;  %v2546_v46 = vld [vmem:[%s3373_s4 + $0x120] sm:$0xff]  ;;  %v2565_v49 = vld [vmem:[%s3373_s4 + $0x98] sm:$0xff] }
  0x1b   :  { %270 = vmatpush.msrb.mxu0 %v2313_v7  ;;  %402 = vmatpush.msrb.mxu3 %v2342_v12  ;;  %v2558_v48 = vld [vmem:[%s3373_s4 + $0x1a0] sm:$0xff]  ;;  %v2572_v50 = vld [vmem:[%s3373_s4 + $0x10] sm:$0xff]  ;;  %v2577_v51 = vld [vmem:[%s3373_s4 + $0x118] sm:$0xff] }
  0x1c   :  { %290 = vmatpush.msrb.mxu1 %v2325_v9  ;;  %383 = vmatpush.msrb.mxu2 %v2354_v14  ;;  %3390 = vst [vmem:[#allocation20_spill] sm:$0xff] %v2572_v50  ;;  %v2582_v52 = vld [vmem:[%s3373_s4 + $0x198] sm:$0xff]  ;;  %v2589_v53 = vld [vmem:[%s3373_s4 + $0x90] sm:$0xff]  ;;  %v2596_v54 = vld [vmem:[%s3373_s4 + $0x8] sm:$0xff] }
  0x1d   :  { %271 = vmatpush.msrb.mxu0 %v2337_v11  ;;  %403 = vmatpush.msrb.mxu3 %v2366_v16  ;;  %3391 = vst [vmem:[#allocation21_spill] sm:$0xff] %v2589_v53  ;;  %v2601_v55 = vld [vmem:[%s3373_s4 + $0x110] sm:$0xff]  ;;  %v2613_v57 = vld [vmem:[%s3373_s4 + $0x88] sm:$0xff]  ;;  %v2621_v59 = vld [vmem:[%s3373_s4] sm:$0xff] }
  0x1e   :  { %291 = vmatpush.msrb.mxu1 %v2349_v13  ;;  %384 = vmatpush.msrb.mxu2 %v2378_v18  ;;  %3392 = vst [vmem:[#allocation22_spill] sm:$0xff] %v2596_v54  ;;  %v2606_v56 = vld [vmem:[%s3373_s4 + $0x190] sm:$0xff]  ;;  %v2626_v60 = vld [vmem:[%s3373_s4 + $0x108] sm:$0xff]  ;;  %v2634_v62 = vld [vmem:[%s3373_s4 + $0x80] sm:$0xff] }
  0x1f   :  { %272 = vmatpush.msrb.mxu0 %v2361_v15  ;;  %404 = vmatpush.msrb.mxu3 %v2390_v20  ;;  %3393 = vst [vmem:[#allocation23_spill] sm:$0xff] %v2613_v57  ;;  %v2642_v2 = vld [vmem:[%s3373_s4 + $0x188] sm:$0xff]  ;;  %v2647_v4 = vld [vmem:[%s3373_s4 + $0x100] sm:$0xff] }
  0x20   :  { %292 = vmatpush.msrb.mxu1 %v2373_v17  ;;  %385 = vmatpush.msrb.mxu2 %v2402_v22  ;;  %3394 = vst [vmem:[#allocation24_spill] sm:$0xff] %v2621_v59  ;;  %v2656_v6 = vld [vmem:[%s3373_s4 + $0x180] sm:$0xff] }
  0x21   :  { %273 = vmatpush.msrb.mxu0 %v2385_v19  ;;  %405 = vmatpush.msrb.mxu3 %v2414_v24  ;;  %3395 = vst [vmem:[#allocation25_spill] sm:$0xff] %v2642_v2 }
  0x22   :  { %293 = vmatpush.msrb.mxu1 %v2397_v21  ;;  %386 = vmatpush.msrb.mxu2 %v2426_v26 }
  0x23   :  { %274 = vmatpush.msrb.mxu0 %v2409_v23  ;;  %406 = vmatpush.msrb.mxu3 %v2438_v28 }
  0x24   :  { %294 = vmatpush.msrb.mxu1 %v2421_v25  ;;  %387 = vmatpush.msrb.mxu2 %v2450_v30 }
  0x25   :  { %275 = vmatpush.msrb.mxu0 %v2433_v27  ;;  %407 = vmatpush.msrb.mxu3 %v2462_v32 }
  0x26   :  { %295 = vmatpush.msrb.mxu1 %v2445_v29  ;;  %388 = vmatpush.msrb.mxu2 %v2474_v34 }
  0x27   :  { %276 = vmatpush.msrb.mxu0 %v2457_v31  ;;  %408 = vmatpush.msrb.mxu3 %v2486_v36 }
  0x28   :  { %296 = vmatpush.msrb.mxu1 %v2469_v33  ;;  %389 = vmatpush.msrb.mxu2 %v2498_v38 }
  0x29   :  { %277 = vmatpush.msrb.mxu0 %v2481_v35  ;;  %409 = vmatpush.msrb.mxu3 %v2510_v40 }
  0x2a   :  { %297 = vmatpush.msrb.mxu1 %v2493_v37  ;;  %390 = vmatpush.msrb.mxu2 %v2522_v42 }
  0x2b   :  { %278 = vmatpush.msrb.mxu0 %v2505_v39  ;;  %410 = vmatpush.msrb.mxu3 %v2534_v44 }
  0x2c   :  { %298 = vmatpush.msrb.mxu1 %v2517_v41  ;;  %391 = vmatpush.msrb.mxu2 %v2546_v46 }
  0x2d   :  { %279 = vmatpush.msrb.mxu0 %v2529_v43  ;;  %411 = vmatpush.msrb.mxu3 %v2558_v48 }
  0x2e   :  { %299 = vmatpush.msrb.mxu1 %v2541_v45  ;;  %392 = vmatpush.msrb.mxu2 %v2577_v51 }
  0x2f   :  { %280 = vmatpush.msrb.mxu0 %v2553_v47  ;;  %412 = vmatpush.msrb.mxu3 %v2582_v52 }
  0x30   :  { %300 = vmatpush.msrb.mxu1 %v2565_v49  ;;  %393 = vmatpush.msrb.mxu2 %v2601_v55 }
  0x31   :  { %281 = vmatpush.msrb.mxu0 %v2572_v50  ;;  %413 = vmatpush.msrb.mxu3 %v2606_v56  ;;  %v434_v50 = vand.u32 2147483647, %v2330_v10 }
  0x32   :  { %301 = vmatpush.msrb.mxu1 %v2589_v53  ;;  %394 = vmatpush.msrb.mxu2 %v2626_v60  ;;  %v451_v53 = vand.u32 2147483647, %v2318_v8 }
  0x33   :  { %282 = vmatpush.msrb.mxu0 %v2596_v54  ;;  %v324_v54 = vand.u32 2147483647, %v2273_v0  ;;  %414 = vmatpush.msrb.mxu3 %v2642_v2 }
  0x34   :  { %302 = vmatpush.msrb.mxu1 %v2613_v57  ;;  %v340_v57 = vand.u32 2147483647, %v2278_v1 }
  0x35   :  { %283 = vmatpush.msrb.mxu0 %v2621_v59 }
  0x36   :  { %303 = vmatpush.msrb.mxu1 %v2634_v62 }
  0x37   :  { %459 = vmatpush.msra.mxu0 %v436_v58 }
  0x38   :  { %24 = vsyncpa [#allocation14], 0  ;;  %v323_v0 = vand.u32 2147483647, %v2289_v3  ;;  %v450_v8 = vand.u32 2147483647, %v2342_v12  ;;  %479 = vmatpush.msra.mxu1 %v452_v61  ;;  %395 = vmatpush.msrb.mxu2 %v2647_v4 }
  0x39   :  { %v339_v59 = vand.u32 2147483647, %v2301_v5  ;;  %v433_v2 = vand.u32 2147483647, %v2354_v14  ;;  %415 = vmatpush.msrb.mxu3 %v2656_v6  ;;  %460 = vmatpush.msra.mxu0 %v435_v63  ;;  %v322_v1 = vand.u32 2147483647, %v2313_v7 }
  0x3a   :  { %v449_v10 = vand.u32 2147483647, %v2366_v16  ;;  %480 = vmatpush.msra.mxu1 %v451_v53  ;;  %499 = vmatpush.msra.mxu2 %v324_v54  ;;  %v338_v3 = vand.u32 2147483647, %v2325_v9  ;;  %v432_v12 = vand.u32 2147483647, %v2378_v18 }
  0x3b   :  { %519 = vmatpush.msra.mxu3 %v340_v57  ;;  %461 = vmatpush.msra.mxu0 %v434_v50  ;;  %v321_v58 = vand.u32 2147483647, %v2337_v11  ;;  %v448_v5 = vand.u32 2147483647, %v2390_v20  ;;  %v337_v14 = vand.u32 2147483647, %v2349_v13 }
  0x3c   :  { %481 = vmatpush.msra.mxu1 %v450_v8  ;;  %500 = vmatpush.msra.mxu2 %v323_v0  ;;  %v431_v7 = vand.u32 2147483647, %v2402_v22  ;;  %v320_v16 = vand.u32 2147483647, %v2361_v15  ;;  %v447_v9 = vand.u32 2147483647, %v2414_v24 }
  0x3d   :  { %520 = vmatpush.msra.mxu3 %v339_v59  ;;  %462 = vmatpush.msra.mxu0 %v433_v2  ;;  %v336_v18 = vand.u32 2147483647, %v2373_v17  ;;  %v430_v11 = vand.u32 2147483647, %v2426_v26  ;;  %v319_v20 = vand.u32 2147483647, %v2385_v19 }
  0x3e   :  { %482 = vmatpush.msra.mxu1 %v449_v10  ;;  %501 = vmatpush.msra.mxu2 %v322_v1  ;;  %v446_v13 = vand.u32 2147483647, %v2438_v28  ;;  %v335_v22 = vand.u32 2147483647, %v2397_v21  ;;  %v429_v15 = vand.u32 2147483647, %v2450_v30 }
  0x3f   :  { %521 = vmatpush.msra.mxu3 %v338_v3  ;;  %463 = vmatpush.msra.mxu0 %v432_v12  ;;  %v318_v24 = vand.u32 2147483647, %v2409_v23  ;;  %v445_v17 = vand.u32 2147483647, %v2462_v32  ;;  %v334_v26 = vand.u32 2147483647, %v2421_v25 }
  0x40   :  { %483 = vmatpush.msra.mxu1 %v448_v5  ;;  %502 = vmatpush.msra.mxu2 %v321_v58  ;;  %v428_v19 = vand.u32 2147483647, %v2474_v34  ;;  %v317_v28 = vand.u32 2147483647, %v2433_v27  ;;  %v444_v21 = vand.u32 2147483647, %v2486_v36 }
  0x41   :  { %522 = vmatpush.msra.mxu3 %v337_v14  ;;  %464 = vmatpush.msra.mxu0 %v431_v7  ;;  %v333_v30 = vand.u32 2147483647, %v2445_v29  ;;  %v427_v23 = vand.u32 2147483647, %v2498_v38  ;;  %v316_v32 = vand.u32 2147483647, %v2457_v31 }
  0x42   :  { %484 = vmatpush.msra.mxu1 %v447_v9  ;;  %503 = vmatpush.msra.mxu2 %v320_v16  ;;  %v443_v25 = vand.u32 2147483647, %v2510_v40  ;;  %v332_v34 = vand.u32 2147483647, %v2469_v33  ;;  %v426_v27 = vand.u32 2147483647, %v2522_v42 }
  0x43   :  { %523 = vmatpush.msra.mxu3 %v336_v18  ;;  %465 = vmatpush.msra.mxu0 %v430_v11  ;;  %v315_v36 = vand.u32 2147483647, %v2481_v35  ;;  %v442_v29 = vand.u32 2147483647, %v2534_v44  ;;  %v331_v38 = vand.u32 2147483647, %v2493_v37 }
  0x44   :  { %485 = vmatpush.msra.mxu1 %v446_v13  ;;  %504 = vmatpush.msra.mxu2 %v319_v20  ;;  %v425_v31 = vand.u32 2147483647, %v2546_v46  ;;  %v314_v40 = vand.u32 2147483647, %v2505_v39  ;;  %v441_v33 = vand.u32 2147483647, %v2558_v48 }
  0x45   :  { %524 = vmatpush.msra.mxu3 %v335_v22  ;;  %466 = vmatpush.msra.mxu0 %v429_v15  ;;  %v330_v42 = vand.u32 2147483647, %v2517_v41  ;;  %v424_v35 = vand.u32 2147483647, %v2577_v51  ;;  %v313_v44 = vand.u32 2147483647, %v2529_v43 }
  0x46   :  { %486 = vmatpush.msra.mxu1 %v445_v17  ;;  %505 = vmatpush.msra.mxu2 %v318_v24  ;;  %v440_v37 = vand.u32 2147483647, %v2582_v52  ;;  %v329_v46 = vand.u32 2147483647, %v2541_v45  ;;  %v423_v39 = vand.u32 2147483647, %v2601_v55 }
  0x47   :  { %525 = vmatpush.msra.mxu3 %v334_v26  ;;  %467 = vmatpush.msra.mxu0 %v428_v19  ;;  %v312_v48 = vand.u32 2147483647, %v2553_v47  ;;  %v439_v41 = vand.u32 2147483647, %v2606_v56  ;;  %v328_v50 = vand.u32 2147483647, %v2565_v49 }
  0x48   :  { %487 = vmatpush.msra.mxu1 %v444_v21  ;;  %506 = vmatpush.msra.mxu2 %v317_v28  ;;  %v422_v43 = vand.u32 2147483647, %v2626_v60  ;;  %v3396_v51 = vld [vmem:[#allocation20_spill] sm:$0xff]  ;;  %v3397_v53 = vld [vmem:[#allocation25_spill] sm:$0xff]  ;;  %v421_v47 = vand.u32 2147483647, %v2647_v4 }
  0x49   :  { %526 = vmatpush.msra.mxu3 %v333_v30  ;;  %468 = vmatpush.msra.mxu0 %v427_v23  ;;  %v311_v52 = vand.u32 2147483647, %v3396_v51  ;;  %v438_v45 = vand.u32 2147483647, %v3397_v53  ;;  %v3398_v54 = vld [vmem:[#allocation21_spill] sm:$0xff]  ;;  %v3399_v56 = vld [vmem:[#allocation22_spill] sm:$0xff] }
  0x4a   :  { %488 = vmatpush.msra.mxu1 %v443_v25  ;;  %507 = vmatpush.msra.mxu2 %v316_v32  ;;  %v327_v55 = vand.u32 2147483647, %v3398_v54  ;;  %v310_v57 = vand.u32 2147483647, %v3399_v56  ;;  %v437_v49 = vand.u32 2147483647, %v2656_v6 }
  0x4b   :  { %527 = vmatpush.msra.mxu3 %v332_v34  ;;  %469 = vmatpush.msra.mxu0 %v426_v27  ;;  %v3400_v59 = vld [vmem:[#allocation23_spill] sm:$0xff]  ;;  %v3401_v61 = vld [vmem:[#allocation24_spill] sm:$0xff]  ;;  %v325_v2 = vand.u32 2147483647, %v2634_v62  ;;  %v1721_v22 = vld [vmem:[%s3373_s4 + $0x278] sm:$0xff]  ;;  %vm1484_vm2 = vcmask 1041408  }
  0x4c   :  { %489 = vmatpush.msra.mxu1 %v442_v29  ;;  %508 = vmatpush.msra.mxu2 %v315_v36  ;;  %v326_v60 = vand.u32 2147483647, %v3400_v59  ;;  %v309_v63 = vand.u32 2147483647, %v3401_v61  ;;  %v1737_v24 = vld [vmem:[%s3373_s4 + $0x2f8] sm:$0xff]  ;;  %v1720_v19 = vld [vmem:[%s3373_s4 + $0x270] sm:$0xff] }
  0x4d   :  { %528 = vmatpush.msra.mxu3 %v331_v38  ;;  %470 = vmatpush.msra.mxu0 %v425_v31  ;;  %v632_v21 = vand.u32 2147483647, %v1721_v22  ;;  %v1736_v23 = vld [vmem:[%s3373_s4 + $0x2f0] sm:$0xff]  ;;  %v648_v32 = vand.u32 2147483647, %v1737_v24  ;;  %v1719_v34 = vld [vmem:[%s3373_s4 + $0x268] sm:$0xff] }
  0x4e   :  { %490 = vmatpush.msra.mxu1 %v441_v33  ;;  %509 = vmatpush.msra.mxu2 %v314_v40  ;;  %v631_v27 = vand.u32 2147483647, %v1720_v19  ;;  %v1735_v36 = vld [vmem:[%s3373_s4 + $0x2e8] sm:$0xff]  ;;  %v647_v38 = vand.u32 2147483647, %v1736_v23  ;;  %v1718_v33 = vld [vmem:[%s3373_s4 + $0x260] sm:$0xff] }
  0x4f   :  { %529 = vmatpush.msra.mxu3 %v330_v42  ;;  %471 = vmatpush.msra.mxu0 %v424_v35  ;;  %v630_v40 = vand.u32 2147483647, %v1719_v34  ;;  %v646_v42 = vand.u32 2147483647, %v1735_v36  ;;  %v1734_v35 = vld [vmem:[%s3373_s4 + $0x2e0] sm:$0xff]  ;;  %v1732_v51 = vld [vmem:[%s3373_s4 + $0x2d0] sm:$0xff] }
  0x50   :  { %491 = vmatpush.msra.mxu1 %v440_v37  ;;  %510 = vmatpush.msra.mxu2 %v313_v44  ;;  %v629_v44 = vand.u32 2147483647, %v1718_v33  ;;  %v1715_v53 = vld [vmem:[%s3373_s4 + $0x248] sm:$0xff]  ;;  %v1713_v59 = vld [vmem:[%s3373_s4 + $0x238] sm:$0xff]  ;;  %vm1471_vm3 = vcmask 73728   ;;  %vm1480_vm4 = vcmask 80896  }
  0x51   :  { %530 = vmatpush.msra.mxu3 %v329_v46  ;;  %472 = vmatpush.msra.mxu0 %v423_v39  ;;  %v1717_v46 = vld [vmem:[%s3373_s4 + $0x258] sm:$0xff]  ;;  %v645_v39 = vand.u32 2147483647, %v1734_v35  ;;  %v1731_v54 = vld [vmem:[%s3373_s4 + $0x2c8] sm:$0xff]  ;;  %v626_v56 = vand.u32 2147483647, %v1715_v53 }
  0x52   :  { %492 = vmatpush.msra.mxu1 %v439_v41  ;;  %511 = vmatpush.msra.mxu2 %v312_v48  ;;  %v1733_v41 = vld [vmem:[%s3373_s4 + $0x2d8] sm:$0xff]  ;;  %s1559_s1 = sshll.u32 %s3377_s8, 4  ;;  %s2116_s2 = smov [#allocation7]   ;;  %vm1537_vm5 = vcmask 65536   ;;  %s1560_s1 = int_to_ptr.hbm [resolvable:$true] %s1559_s1 }
  0x53   :  { %531 = vmatpush.msra.mxu3 %v328_v50  ;;  %473 = vmatpush.msra.mxu0 %v422_v43  ;;  %v1716_v50 = vld [vmem:[%s3373_s4 + $0x250] sm:$0xff]  ;;  %v628_v43 = vand.u32 2147483647, %v1717_v46  ;;  %v1729_v61 = vld [vmem:[%s3373_s4 + $0x2b8] sm:$0xff]  ;;  %s1579_s23 = sshll.u32 %s2116_s2, 4  ;;  %s1581_s26 = sshll.u32 %s3379_s10, 4  ;;  %s1580_s23 = int_to_ptr.vmem [resolvable:$true] %s1579_s23  ;;  %s1582_s26 = int_to_ptr.hbm [resolvable:$true] %s1581_s26 }
  0x54   :  { %493 = vmatpush.msra.mxu1 %v438_v45  ;;  %512 = vmatpush.msra.mxu2 %v311_v52  ;;  %v644_v52 = vand.u32 2147483647, %v1733_v41  ;;  %v627_v45 = vand.u32 2147483647, %v1716_v50  ;;  %s1603_s28 = sshll.u32 %s3381_s12, 4  ;;  %s2117_s29 = smov [#allocation10]   ;;  %s1604_s28 = int_to_ptr.hbm [resolvable:$true] %s1603_s28 }
  0x55   :  { %532 = vmatpush.msra.mxu3 %v327_v55  ;;  %474 = vmatpush.msra.mxu0 %v421_v47  ;;  %v643_v55 = vand.u32 2147483647, %v1732_v51  ;;  %v1714_v47 = vld [vmem:[%s3373_s4 + $0x240] sm:$0xff]  ;;  %s1601_s8 = sshll.u32 %s2117_s29, 4  ;;  %s2118_s30 = smov [#allocation2]   ;;  %s1602_s8 = int_to_ptr.vmem [resolvable:$true] %s1601_s8 }
  0x56   :  { %494 = vmatpush.msra.mxu1 %v437_v49  ;;  %513 = vmatpush.msra.mxu2 %v310_v57  ;;  %v1730_v57 = vld [vmem:[%s3373_s4 + $0x2c0] sm:$0xff]  ;;  %v642_v49 = vand.u32 2147483647, %v1731_v54  ;;  %s1546_s15 = sshll.u32 %s2118_s30, 4  ;;  %s1548_s17 = sshll.u32 %s3376_s7, 4  ;;  %s1547_s15 = int_to_ptr.vmem [resolvable:$true] %s1546_s15  ;;  %s1549_s17 = int_to_ptr.hbm [resolvable:$true] %s1548_s17 }
  0x57   :  { %533 = vmatpush.msra.mxu3 %v326_v60  ;;  %v625_v60 = vand.u32 2147483647, %v1714_v47  ;;  %s1570_s19 = sshll.u32 %s3378_s9, 4  ;;  %s2119_s20 = smov [#allocation6]   ;;  %s1571_s19 = int_to_ptr.hbm [resolvable:$true] %s1570_s19 }
  0x58   :  { %514 = vmatpush.msra.mxu2 %v309_v63  ;;  %v641_v63 = vand.u32 2147483647, %v1730_v57  ;;  %s1568_s12 = sshll.u32 %s2119_s20, 4  ;;  %s2120_s21 = smov [#allocation9]   ;;  %s1569_s12 = int_to_ptr.vmem [resolvable:$true] %s1568_s12 }
  0x59   :  { %534 = vmatpush.msra.mxu3 %v325_v2  ;;  %v1712_v2 = vld [vmem:[%s3373_s4 + $0x230] sm:$0xff]  ;;  %s1592_s0 = sshll.u32 %s3380_s11, 4  ;;  %s2121_s7 = smov [#allocation12]   ;;  %s1593_s0 = int_to_ptr.hbm [resolvable:$true] %s1592_s0 }
  0x5a   :  { %s1614_s9 = sshll.u32 %s3382_s13, 4  ;;  %s2122_s24 = smov [#allocation13]   ;;  %s1615_s9 = int_to_ptr.hbm [resolvable:$true] %s1614_s9 }
  0x5b   :  { %s1623_s25 = sshll.u32 %s2122_s24, 4  ;;  %s1625_s27 = sshll.u32 %s3383_s14, 4  ;;  %s1624_s25 = int_to_ptr.vmem [resolvable:$true] %s1623_s25  ;;  %s1626_s27 = int_to_ptr.hbm [resolvable:$true] %s1625_s27 }
  0x80   :  { %v207_v8 = vpop.permute.xlu0 %206 }
  0x93   :  { %v128_v4 = vpop.f32.mrf.mxu0 }
  0x94   :  { %v148_v6 = vpop.f32.mrf.mxu1 }
  0x95   :  { %v178_v0 = vpop.f32.mrf.mxu2 }
  0x96   :  { %v202_v1 = vsub.f32 %v128_v4, %v178_v0  ;;  %v211_v10 = vadd.f32 %v178_v0, %v128_v4  ;;  %v198_v3 = vpop.f32.mrf.mxu3  ;;  %v624_v4 = vand.u32 2147483647, %v1713_v59  ;;  %v640_v0 = vand.u32 2147483647, %v1729_v61 }
  0x97   :  { %v203_v12 = vsub.f32 %v148_v6, %v198_v3  ;;  %v212_v58 = vadd.f32 %v198_v3, %v148_v6  ;;  %v1728_v6 = vld [vmem:[%s3373_s4 + $0x2b0] sm:$0xff] }
  0x98   :  { %v209_v5 = vadd.f32 %v207_v8, %v202_v1  ;;  %v213_v14 = vadd.f32 %v211_v10, %v207_v8  ;;  %v623_v1 = vand.u32 2147483647, %v1712_v2  ;;  %v1727_v10 = vld [vmem:[%s3373_s4 + $0x2a8] sm:$0xff]  ;;  %v639_v3 = vand.u32 2147483647, %v1728_v6 }
  0x99   :  { %v210_v7 = vadd.f32 %v207_v8, %v203_v12  ;;  %v214_v62 = vadd.f32 %v212_v58, %v207_v8  ;;  %v1711_v8 = vld [vmem:[%s3373_s4 + $0x228] sm:$0xff]  ;;  %v1710_v12 = vld [vmem:[%s3373_s4 + $0x220] sm:$0xff] }
  0x9a   :  { %v219_v16 = vmax.f32 %v209_v5, 0.0  ;;  %v221_v9 = vmax.f32 %v213_v14, 0.0  ;;  %215 = vst [vmem:[#allocation2] sm:$0xff] %v209_v5  ;;  %v622_v58 = vand.u32 2147483647, %v1711_v8  ;;  %v1726_v5 = vld [vmem:[%s3373_s4 + $0x2a0] sm:$0xff] }
  0x9b   :  { %v220_v18 = vmax.f32 %v210_v7, 0.0  ;;  %v222_v11 = vmax.f32 %v214_v62, 0.0  ;;  %216 = vst [vmem:[#allocation2 + $0x8] sm:$0xff] %v210_v7  ;;  %v1709_v7 = vld [vmem:[%s3373_s4 + $0x218] sm:$0xff] }
  0x9c   :  { %v227_v20 = vadd.f32 %v221_v9, %v219_v16  ;;  %217 = vst [vmem:[#allocation4] sm:$0xff] %v213_v14  ;;  %v231_v26 = vsub.f32 %v221_v9, %v219_v16  ;;  %v638_v14 = vand.u32 2147483647, %v1727_v10  ;;  %1551 = dma.vmem_to_hbm [thread:$0]  %s1547_s15, 256, %s1549_s17, [#allocation3]  }
  0x9d   :  { %v228_v13 = vadd.f32 %v222_v11, %v220_v18  ;;  %218 = vst [vmem:[#allocation4 + $0x8] sm:$0xff] %v214_v62  ;;  %v232_v28 = vsub.f32 %v222_v11, %v220_v18  ;;  %v621_v62 = vand.u32 2147483647, %v1710_v12 }
  0x9e   :  { %v2723_v15 = vmul.f32 0.5, %v227_v20  ;;  %223 = vst [vmem:[#allocation6] sm:$0xff] %v219_v16  ;;  %v2746_v29 = vmul.f32 0.5, %v231_v26  ;;  %v1725_v16 = vld [vmem:[%s3373_s4 + $0x298] sm:$0xff]  ;;  %v1724_v20 = vld [vmem:[%s3373_s4 + $0x290] sm:$0xff]  ;;  %v1723_v26 = vld [vmem:[%s3373_s4 + $0x288] sm:$0xff] }
  0x9f   :  { %v2728_v17 = vmul.f32 0.5, %v228_v13  ;;  %224 = vst [vmem:[#allocation6 + $0x8] sm:$0xff] %v220_v18  ;;  %v2748_v31 = vmul.f32 0.5, %v232_v28  ;;  %v1708_v18 = vld [vmem:[%s3373_s4 + $0x210] sm:$0xff]  ;;  %v636_v13 = vand.u32 2147483647, %v1725_v16 }
  0xa0   :  { %225 = vst [vmem:[#allocation7] sm:$0xff] %v221_v9  ;;  %284 = vmatmul.f32.vlgmr.msrb.gmra.mxu0 %v2723_v15  ;;  %v376_v30 = vrot.slane %v2723_v15, 1  ;;  %v455_v37 = vrot.slane %v2746_v29, 1  ;;  %v637_v9 = vand.u32 2147483647, %v1726_v5 }
  0xa1   :  { %226 = vst [vmem:[#allocation7 + $0x8] sm:$0xff] %v222_v11  ;;  %304 = vmatmul.f32.vlgmr.msrb.gmra.mxu1 %v2728_v17  ;;  %576 = vmatpush.msrb.mxu0 %v1721_v22  ;;  %v377_v25 = vrot.slane %v2728_v17, 1  ;;  %v456_v48 = vrot.slane %v2748_v31, 1  ;;  %v620_v11 = vand.u32 2147483647, %v1709_v7  ;;  %v1707_v22 = vld [vmem:[%s3373_s4 + $0x208] sm:$0xff] }
  0xa2   :  { %596 = vmatpush.msrb.mxu1 %v1737_v24  ;;  %396 = vmatmul.f32.vlgmr.msrb.gmra.mxu2 %v376_v30  ;;  %v619_v24 = vand.u32 2147483647, %v1708_v18  ;;  %v618_v28 = vand.u32 2147483647, %v1707_v22  ;;  %v634_v30 = vand.u32 2147483647, %v1723_v26 }
  0xa3   :  { %416 = vmatmul.f32.vlgmr.msrb.gmra.mxu3 %v377_v25  ;;  %577 = vmatpush.msrb.mxu0 %v1720_v19  ;;  %v635_v19 = vand.u32 2147483647, %v1724_v20  ;;  %v572_v25 = vrot.slane %v2723_v15, 2  ;;  %1584 = dma.vmem_to_hbm [thread:$0]  %s1580_s23, 256, %s1582_s26, [#allocation8]  }
  0xa4   :  { %597 = vmatpush.msrb.mxu1 %v1736_v23  ;;  %653 = vmatpush.msrb.mxu2 %v632_v21  ;;  %v1706_v21 = vld [vmem:[%s3373_s4 + $0x200] sm:$0xff] }
  0xa5   :  { %673 = vmatpush.msrb.mxu3 %v648_v32  ;;  %578 = vmatpush.msrb.mxu0 %v1719_v34  ;;  %v1722_v23 = vld [vmem:[%s3373_s4 + $0x280] sm:$0xff]  ;;  %v617_v32 = vand.u32 2147483647, %v1706_v21  ;;  %v1753_v34 = vld [vmem:[%s3373_s4 + $0x378] sm:$0xff] }
  0xa6   :  { %598 = vmatpush.msrb.mxu1 %v1735_v36  ;;  %654 = vmatpush.msrb.mxu2 %v631_v27  ;;  %v633_v27 = vand.u32 2147483647, %v1722_v23  ;;  %v573_v36 = vrot.slane %v2728_v17, 2 }
  0xa7   :  { %674 = vmatpush.msrb.mxu3 %v647_v38  ;;  %579 = vmatpush.msrb.mxu0 %v1718_v33  ;;  %v1769_v38 = vld [vmem:[%s3373_s4 + $0x3f8] sm:$0xff]  ;;  %v787_v33 = vand.u32 2147483647, %v1753_v34 }
  0xa8   :  { %599 = vmatpush.msrb.mxu1 %v1734_v35  ;;  %655 = vmatpush.msrb.mxu2 %v630_v40  ;;  %v1752_v40 = vld [vmem:[%s3373_s4 + $0x370] sm:$0xff] }
  0xa9   :  { %675 = vmatpush.msrb.mxu3 %v646_v42  ;;  %475 = vmatmul.f32.vlgmr.msra.gmra.mxu0 %v455_v37  ;;  %v649_v42 = vrot.slane %v2746_v29, 2  ;;  %v1768_v35 = vld [vmem:[%s3373_s4 + $0x3f0] sm:$0xff]  ;;  %v650_v37 = vrot.slane %v2748_v31, 2 }
  0xaa   :  { %495 = vmatmul.f32.vlgmr.msra.gmra.mxu1 %v456_v48  ;;  %580 = vmatpush.msrb.mxu0 %v1717_v46  ;;  %v1751_v46 = vld [vmem:[%s3373_s4 + $0x368] sm:$0xff] }
  0xab   :  { %600 = vmatpush.msrb.mxu1 %v1733_v41  ;;  %656 = vmatpush.msrb.mxu2 %v629_v44  ;;  %v803_v44 = vand.u32 2147483647, %v1769_v38  ;;  %v1767_v48 = vld [vmem:[%s3373_s4 + $0x3e8] sm:$0xff]  ;;  %v802_v41 = vand.u32 2147483647, %v1768_v35 }
  0xac   :  { %676 = vmatpush.msrb.mxu3 %v645_v39  ;;  %515 = vmatmul.f32.vlgmr.msra.gmra.mxu2 %v2746_v29  ;;  %v786_v39 = vand.u32 2147483647, %v1752_v40 }
  0xad   :  { %535 = vmatmul.f32.vlgmr.msra.gmra.mxu3 %v2748_v31  ;;  %581 = vmatpush.msrb.mxu0 %v1716_v50  ;;  %v1750_v50 = vld [vmem:[%s3373_s4 + $0x360] sm:$0xff] }
  0xae   :  { %601 = vmatpush.msrb.mxu1 %v1732_v51  ;;  %657 = vmatpush.msrb.mxu2 %v628_v43  ;;  %v785_v43 = vand.u32 2147483647, %v1751_v46  ;;  %v1766_v51 = vld [vmem:[%s3373_s4 + $0x3e0] sm:$0xff] }
  0xaf   :  { %677 = vmatpush.msrb.mxu3 %v644_v52  ;;  %582 = vmatpush.msrb.mxu0 %v1715_v53  ;;  %v801_v52 = vand.u32 2147483647, %v1767_v48  ;;  %v1749_v53 = vld [vmem:[%s3373_s4 + $0x358] sm:$0xff] }
  0xb0   :  { %602 = vmatpush.msrb.mxu1 %v1731_v54  ;;  %658 = vmatpush.msrb.mxu2 %v627_v45  ;;  %v784_v45 = vand.u32 2147483647, %v1750_v50  ;;  %v1765_v54 = vld [vmem:[%s3373_s4 + $0x3d8] sm:$0xff] }
  0xb1   :  { %678 = vmatpush.msrb.mxu3 %v643_v55  ;;  %583 = vmatpush.msrb.mxu0 %v1714_v47  ;;  %v800_v55 = vand.u32 2147483647, %v1766_v51  ;;  %v1748_v47 = vld [vmem:[%s3373_s4 + $0x350] sm:$0xff] }
  0xb2   :  { %603 = vmatpush.msrb.mxu1 %v1730_v57  ;;  %659 = vmatpush.msrb.mxu2 %v626_v56  ;;  %v783_v56 = vand.u32 2147483647, %v1749_v53  ;;  %v1764_v57 = vld [vmem:[%s3373_s4 + $0x3d0] sm:$0xff] }
  0xb3   :  { %679 = vmatpush.msrb.mxu3 %v642_v49  ;;  %584 = vmatpush.msrb.mxu0 %v1713_v59  ;;  %v799_v49 = vand.u32 2147483647, %v1765_v54  ;;  %v1747_v59 = vld [vmem:[%s3373_s4 + $0x348] sm:$0xff] }
  0xb4   :  { %604 = vmatpush.msrb.mxu1 %v1729_v61  ;;  %660 = vmatpush.msrb.mxu2 %v625_v60  ;;  %v782_v60 = vand.u32 2147483647, %v1748_v47  ;;  %v1763_v61 = vld [vmem:[%s3373_s4 + $0x3c8] sm:$0xff] }
  0xb5   :  { %680 = vmatpush.msrb.mxu3 %v641_v63  ;;  %585 = vmatpush.msrb.mxu0 %v1712_v2  ;;  %v798_v63 = vand.u32 2147483647, %v1764_v57  ;;  %v1746_v2 = vld [vmem:[%s3373_s4 + $0x340] sm:$0xff] }
  0xb6   :  { %605 = vmatpush.msrb.mxu1 %v1728_v6  ;;  %661 = vmatpush.msrb.mxu2 %v624_v4  ;;  %v781_v4 = vand.u32 2147483647, %v1747_v59  ;;  %v1762_v6 = vld [vmem:[%s3373_s4 + $0x3c0] sm:$0xff] }
  0xb7   :  { %681 = vmatpush.msrb.mxu3 %v640_v0  ;;  %586 = vmatpush.msrb.mxu0 %v1711_v8  ;;  %v797_v0 = vand.u32 2147483647, %v1763_v61  ;;  %v1745_v8 = vld [vmem:[%s3373_s4 + $0x338] sm:$0xff] }
  0xb8   :  { %606 = vmatpush.msrb.mxu1 %v1727_v10  ;;  %662 = vmatpush.msrb.mxu2 %v623_v1  ;;  %v780_v1 = vand.u32 2147483647, %v1746_v2  ;;  %v1761_v10 = vld [vmem:[%s3373_s4 + $0x3b8] sm:$0xff] }
  0xb9   :  { %682 = vmatpush.msrb.mxu3 %v639_v3  ;;  %587 = vmatpush.msrb.mxu0 %v1710_v12  ;;  %v796_v3 = vand.u32 2147483647, %v1762_v6  ;;  %v1744_v12 = vld [vmem:[%s3373_s4 + $0x330] sm:$0xff] }
  0xba   :  { %607 = vmatpush.msrb.mxu1 %v1726_v5  ;;  %663 = vmatpush.msrb.mxu2 %v622_v58  ;;  %v779_v58 = vand.u32 2147483647, %v1745_v8  ;;  %v1760_v5 = vld [vmem:[%s3373_s4 + $0x3b0] sm:$0xff] }
  0xbb   :  { %683 = vmatpush.msrb.mxu3 %v638_v14  ;;  %588 = vmatpush.msrb.mxu0 %v1709_v7  ;;  %v795_v14 = vand.u32 2147483647, %v1761_v10  ;;  %v1743_v7 = vld [vmem:[%s3373_s4 + $0x328] sm:$0xff] }
  0xbc   :  { %608 = vmatpush.msrb.mxu1 %v1725_v16  ;;  %664 = vmatpush.msrb.mxu2 %v621_v62  ;;  %v778_v62 = vand.u32 2147483647, %v1744_v12  ;;  %v1759_v16 = vld [vmem:[%s3373_s4 + $0x3a8] sm:$0xff] }
  0xbd   :  { %684 = vmatpush.msrb.mxu3 %v637_v9  ;;  %589 = vmatpush.msrb.mxu0 %v1708_v18  ;;  %v794_v9 = vand.u32 2147483647, %v1760_v5  ;;  %v1742_v18 = vld [vmem:[%s3373_s4 + $0x320] sm:$0xff] }
  0xbe   :  { %609 = vmatpush.msrb.mxu1 %v1724_v20  ;;  %665 = vmatpush.msrb.mxu2 %v620_v11  ;;  %v777_v11 = vand.u32 2147483647, %v1743_v7  ;;  %v1758_v20 = vld [vmem:[%s3373_s4 + $0x3a0] sm:$0xff] }
  0xbf   :  { %685 = vmatpush.msrb.mxu3 %v636_v13  ;;  %590 = vmatpush.msrb.mxu0 %v1707_v22  ;;  %v793_v13 = vand.u32 2147483647, %v1759_v16  ;;  %v1741_v22 = vld [vmem:[%s3373_s4 + $0x318] sm:$0xff] }
  0xc0   :  { %610 = vmatpush.msrb.mxu1 %v1723_v26  ;;  %666 = vmatpush.msrb.mxu2 %v619_v24  ;;  %v776_v24 = vand.u32 2147483647, %v1742_v18  ;;  %v1757_v26 = vld [vmem:[%s3373_s4 + $0x398] sm:$0xff] }
  0xc1   :  { %686 = vmatpush.msrb.mxu3 %v635_v19  ;;  %591 = vmatpush.msrb.mxu0 %v1706_v21  ;;  %v792_v19 = vand.u32 2147483647, %v1758_v20  ;;  %v775_v21 = vand.u32 2147483647, %v1741_v22 }
  0xc2   :  { %611 = vmatpush.msrb.mxu1 %v1722_v23  ;;  %667 = vmatpush.msrb.mxu2 %v618_v28  ;;  %v1740_v28 = vld [vmem:[%s3373_s4 + $0x310] sm:$0xff]  ;;  %v791_v23 = vand.u32 2147483647, %v1757_v26 }
  0xc3   :  { %687 = vmatpush.msrb.mxu3 %v634_v30  ;;  %592 = vmatmul.f32.vlgmr.msrb.gmra.mxu0 %v572_v25  ;;  %v1756_v30 = vld [vmem:[%s3373_s4 + $0x390] sm:$0xff]  ;;  %v774_v25 = vand.u32 2147483647, %v1740_v28 }
  0xc4   :  { %612 = vmatmul.f32.vlgmr.msrb.gmra.mxu1 %v573_v36  ;;  %731 = vmatpush.msra.mxu0 %v1753_v34  ;;  %v1755_v34 = vld [vmem:[%s3373_s4 + $0x388] sm:$0xff] }
  0xc5   :  { %751 = vmatpush.msra.mxu1 %v1769_v38  ;;  %668 = vmatpush.msrb.mxu2 %v617_v32  ;;  %v1739_v32 = vld [vmem:[%s3373_s4 + $0x308] sm:$0xff]  ;;  %v1738_v38 = vld [vmem:[%s3373_s4 + $0x300] sm:$0xff] }
  0xc6   :  { %688 = vmatpush.msrb.mxu3 %v633_v27  ;;  %669 = vmatmul.f32.vlgmr.msrb.gmra.mxu2 %v649_v42  ;;  %v790_v27 = vand.u32 2147483647, %v1756_v30  ;;  %v773_v36 = vand.u32 2147483647, %v1739_v32  ;;  %v772_v42 = vand.u32 2147483647, %v1738_v38 }
  0xc7   :  { %689 = vmatmul.f32.vlgmr.msrb.gmra.mxu3 %v650_v37  ;;  %732 = vmatpush.msra.mxu0 %v1752_v40  ;;  %v789_v40 = vand.u32 2147483647, %v1755_v34 }
  0xc8   :  { %752 = vmatpush.msra.mxu1 %v1768_v35  ;;  %808 = vmatpush.msra.mxu2 %v787_v33  ;;  %v1754_v33 = vld [vmem:[%s3373_s4 + $0x380] sm:$0xff]  ;;  %v727_v35 = vrot.slane %v2723_v15, 3 }
  0xc9   :  { %828 = vmatpush.msra.mxu3 %v803_v44  ;;  %733 = vmatpush.msra.mxu0 %v1751_v46  ;;  %v1785_v44 = vld [vmem:[%s3373_s4 + $0x478] sm:$0xff]  ;;  %v788_v37 = vand.u32 2147483647, %v1754_v33  ;;  %v728_v46 = vrot.slane %v2728_v17, 3 }
  0xca   :  { %753 = vmatpush.msra.mxu1 %v1767_v48  ;;  %809 = vmatpush.msra.mxu2 %v786_v39  ;;  %v1801_v39 = vld [vmem:[%s3373_s4 + $0x4f8] sm:$0xff]  ;;  %v1784_v48 = vld [vmem:[%s3373_s4 + $0x470] sm:$0xff] }
  0xcb   :  { %829 = vmatpush.msra.mxu3 %v802_v41  ;;  %734 = vmatpush.msra.mxu0 %v1750_v50  ;;  %v942_v41 = vand.u32 2147483647, %v1785_v44  ;;  %v804_v50 = vrot.slane %v2746_v29, 3 }
  0xcc   :  { %754 = vmatpush.msra.mxu1 %v1766_v51  ;;  %810 = vmatpush.msra.mxu2 %v785_v43  ;;  %v1800_v43 = vld [vmem:[%s3373_s4 + $0x4f0] sm:$0xff]  ;;  %v958_v51 = vand.u32 2147483647, %v1801_v39 }
  0xcd   :  { %830 = vmatpush.msra.mxu3 %v801_v52  ;;  %735 = vmatpush.msra.mxu0 %v1749_v53  ;;  %v805_v52 = vrot.slane %v2748_v31, 3  ;;  %v1783_v53 = vld [vmem:[%s3373_s4 + $0x468] sm:$0xff] }
  0xce   :  { %755 = vmatpush.msra.mxu1 %v1765_v54  ;;  %811 = vmatpush.msra.mxu2 %v784_v45  ;;  %v941_v45 = vand.u32 2147483647, %v1784_v48  ;;  %v1799_v54 = vld [vmem:[%s3373_s4 + $0x4e8] sm:$0xff] }
  0xcf   :  { %831 = vmatpush.msra.mxu3 %v800_v55  ;;  %736 = vmatpush.msra.mxu0 %v1748_v47  ;;  %v957_v55 = vand.u32 2147483647, %v1800_v43  ;;  %v1782_v47 = vld [vmem:[%s3373_s4 + $0x460] sm:$0xff] }
  0xd0   :  { %756 = vmatpush.msra.mxu1 %v1764_v57  ;;  %812 = vmatpush.msra.mxu2 %v783_v56  ;;  %v940_v56 = vand.u32 2147483647, %v1783_v53  ;;  %v1798_v57 = vld [vmem:[%s3373_s4 + $0x4e0] sm:$0xff] }
  0xd1   :  { %832 = vmatpush.msra.mxu3 %v799_v49  ;;  %737 = vmatpush.msra.mxu0 %v1747_v59  ;;  %v956_v49 = vand.u32 2147483647, %v1799_v54  ;;  %v1781_v59 = vld [vmem:[%s3373_s4 + $0x458] sm:$0xff] }
  0xd2   :  { %757 = vmatpush.msra.mxu1 %v1763_v61  ;;  %813 = vmatpush.msra.mxu2 %v782_v60  ;;  %v939_v60 = vand.u32 2147483647, %v1782_v47  ;;  %v1797_v61 = vld [vmem:[%s3373_s4 + $0x4d8] sm:$0xff] }
  0xd3   :  { %833 = vmatpush.msra.mxu3 %v798_v63  ;;  %738 = vmatpush.msra.mxu0 %v1746_v2  ;;  %v955_v63 = vand.u32 2147483647, %v1798_v57  ;;  %v1780_v2 = vld [vmem:[%s3373_s4 + $0x450] sm:$0xff] }
  0xd4   :  { %758 = vmatpush.msra.mxu1 %v1762_v6  ;;  %814 = vmatpush.msra.mxu2 %v781_v4  ;;  %v938_v4 = vand.u32 2147483647, %v1781_v59  ;;  %v1796_v6 = vld [vmem:[%s3373_s4 + $0x4d0] sm:$0xff] }
  0xd5   :  { %834 = vmatpush.msra.mxu3 %v797_v0  ;;  %739 = vmatpush.msra.mxu0 %v1745_v8  ;;  %v954_v0 = vand.u32 2147483647, %v1797_v61  ;;  %v1779_v8 = vld [vmem:[%s3373_s4 + $0x448] sm:$0xff] }
  0xd6   :  { %759 = vmatpush.msra.mxu1 %v1761_v10  ;;  %815 = vmatpush.msra.mxu2 %v780_v1  ;;  %v937_v1 = vand.u32 2147483647, %v1780_v2  ;;  %v1795_v10 = vld [vmem:[%s3373_s4 + $0x4c8] sm:$0xff] }
  0xd7   :  { %835 = vmatpush.msra.mxu3 %v796_v3  ;;  %740 = vmatpush.msra.mxu0 %v1744_v12  ;;  %v953_v3 = vand.u32 2147483647, %v1796_v6  ;;  %v1778_v12 = vld [vmem:[%s3373_s4 + $0x440] sm:$0xff] }
  0xd8   :  { %760 = vmatpush.msra.mxu1 %v1760_v5  ;;  %816 = vmatpush.msra.mxu2 %v779_v58  ;;  %v936_v58 = vand.u32 2147483647, %v1779_v8  ;;  %v1794_v5 = vld [vmem:[%s3373_s4 + $0x4c0] sm:$0xff] }
  0xd9   :  { %836 = vmatpush.msra.mxu3 %v795_v14  ;;  %741 = vmatpush.msra.mxu0 %v1743_v7  ;;  %v952_v14 = vand.u32 2147483647, %v1795_v10  ;;  %v1777_v7 = vld [vmem:[%s3373_s4 + $0x438] sm:$0xff] }
  0xda   :  { %761 = vmatpush.msra.mxu1 %v1759_v16  ;;  %817 = vmatpush.msra.mxu2 %v778_v62  ;;  %v935_v62 = vand.u32 2147483647, %v1778_v12  ;;  %v1793_v16 = vld [vmem:[%s3373_s4 + $0x4b8] sm:$0xff] }
  0xdb   :  { %837 = vmatpush.msra.mxu3 %v794_v9  ;;  %742 = vmatpush.msra.mxu0 %v1742_v18  ;;  %v951_v9 = vand.u32 2147483647, %v1794_v5  ;;  %v1776_v18 = vld [vmem:[%s3373_s4 + $0x430] sm:$0xff] }
  0xdc   :  { %762 = vmatpush.msra.mxu1 %v1758_v20  ;;  %818 = vmatpush.msra.mxu2 %v777_v11  ;;  %v934_v11 = vand.u32 2147483647, %v1777_v7  ;;  %v1792_v20 = vld [vmem:[%s3373_s4 + $0x4b0] sm:$0xff] }
  0xdd   :  { %838 = vmatpush.msra.mxu3 %v793_v13  ;;  %743 = vmatpush.msra.mxu0 %v1741_v22  ;;  %v950_v13 = vand.u32 2147483647, %v1793_v16  ;;  %v1775_v22 = vld [vmem:[%s3373_s4 + $0x428] sm:$0xff] }
  0xde   :  { %763 = vmatpush.msra.mxu1 %v1757_v26  ;;  %819 = vmatpush.msra.mxu2 %v776_v24  ;;  %v933_v24 = vand.u32 2147483647, %v1776_v18  ;;  %v1791_v26 = vld [vmem:[%s3373_s4 + $0x4a8] sm:$0xff] }
  0xdf   :  { %839 = vmatpush.msra.mxu3 %v792_v19  ;;  %744 = vmatpush.msra.mxu0 %v1740_v28  ;;  %v949_v19 = vand.u32 2147483647, %v1792_v20  ;;  %v1774_v28 = vld [vmem:[%s3373_s4 + $0x420] sm:$0xff] }
  0xe0   :  { %764 = vmatpush.msra.mxu1 %v1756_v30  ;;  %820 = vmatpush.msra.mxu2 %v775_v21  ;;  %v932_v21 = vand.u32 2147483647, %v1775_v22  ;;  %v1790_v30 = vld [vmem:[%s3373_s4 + $0x4a0] sm:$0xff] }
  0xe1   :  { %840 = vmatpush.msra.mxu3 %v791_v23  ;;  %745 = vmatpush.msra.mxu0 %v1739_v32  ;;  %v948_v23 = vand.u32 2147483647, %v1791_v26  ;;  %v1773_v32 = vld [vmem:[%s3373_s4 + $0x418] sm:$0xff] }
  0xe2   :  { %765 = vmatpush.msra.mxu1 %v1755_v34  ;;  %821 = vmatpush.msra.mxu2 %v774_v25  ;;  %v931_v25 = vand.u32 2147483647, %v1774_v28  ;;  %v1789_v34 = vld [vmem:[%s3373_s4 + $0x498] sm:$0xff] }
  0xe3   :  { %841 = vmatpush.msra.mxu3 %v790_v27  ;;  %746 = vmatpush.msra.mxu0 %v1738_v38  ;;  %v947_v27 = vand.u32 2147483647, %v1790_v30  ;;  %v930_v38 = vand.u32 2147483647, %v1773_v32 }
  0xe4   :  { %766 = vmatpush.msra.mxu1 %v1754_v33  ;;  %822 = vmatpush.msra.mxu2 %v773_v36  ;;  %v1772_v36 = vld [vmem:[%s3373_s4 + $0x410] sm:$0xff]  ;;  %v946_v33 = vand.u32 2147483647, %v1789_v34 }
  0xe5   :  { %842 = vmatpush.msra.mxu3 %v789_v40  ;;  %747 = vmatmul.f32.vlgmr.msra.gmra.mxu0 %v727_v35  ;;  %v1788_v40 = vld [vmem:[%s3373_s4 + $0x490] sm:$0xff]  ;;  %v929_v35 = vand.u32 2147483647, %v1772_v36 }
  0xe6   :  { %767 = vmatmul.f32.vlgmr.msra.gmra.mxu1 %v728_v46  ;;  %886 = vmatpush.msrb.mxu0 %v1785_v44  ;;  %v1787_v44 = vld [vmem:[%s3373_s4 + $0x488] sm:$0xff] }
  0xe7   :  { %906 = vmatpush.msrb.mxu1 %v1801_v39  ;;  %823 = vmatpush.msra.mxu2 %v772_v42  ;;  %v1771_v42 = vld [vmem:[%s3373_s4 + $0x408] sm:$0xff]  ;;  %v1770_v39 = vld [vmem:[%s3373_s4 + $0x400] sm:$0xff] }
  0xe8   :  { %843 = vmatpush.msra.mxu3 %v788_v37  ;;  %824 = vmatmul.f32.vlgmr.msra.gmra.mxu2 %v804_v50  ;;  %v945_v37 = vand.u32 2147483647, %v1788_v40  ;;  %v928_v46 = vand.u32 2147483647, %v1771_v42  ;;  %v927_v50 = vand.u32 2147483647, %v1770_v39 }
  0xe9   :  { %844 = vmatmul.f32.vlgmr.msra.gmra.mxu3 %v805_v52  ;;  %887 = vmatpush.msrb.mxu0 %v1784_v48  ;;  %v944_v48 = vand.u32 2147483647, %v1787_v44 }
  0xea   :  { %907 = vmatpush.msrb.mxu1 %v1800_v43  ;;  %963 = vmatpush.msrb.mxu2 %v942_v41  ;;  %v1786_v41 = vld [vmem:[%s3373_s4 + $0x480] sm:$0xff]  ;;  %v882_v43 = vrot.slane %v2723_v15, 4 }
  0xeb   :  { %983 = vmatpush.msrb.mxu3 %v958_v51  ;;  %888 = vmatpush.msrb.mxu0 %v1783_v53  ;;  %v1817_v51 = vld [vmem:[%s3373_s4 + $0x578] sm:$0xff]  ;;  %v943_v52 = vand.u32 2147483647, %v1786_v41  ;;  %v883_v53 = vrot.slane %v2728_v17, 4 }
  0xec   :  { %908 = vmatpush.msrb.mxu1 %v1799_v54  ;;  %964 = vmatpush.msrb.mxu2 %v941_v45  ;;  %v1833_v45 = vld [vmem:[%s3373_s4 + $0x5f8] sm:$0xff]  ;;  %v1816_v54 = vld [vmem:[%s3373_s4 + $0x570] sm:$0xff] }
  0xed   :  { %984 = vmatpush.msrb.mxu3 %v957_v55  ;;  %889 = vmatpush.msrb.mxu0 %v1782_v47  ;;  %v1097_v55 = vand.u32 2147483647, %v1817_v51  ;;  %v959_v47 = vrot.slane %v2746_v29, 4 }
  0xee   :  { %909 = vmatpush.msrb.mxu1 %v1798_v57  ;;  %965 = vmatpush.msrb.mxu2 %v940_v56  ;;  %v1832_v56 = vld [vmem:[%s3373_s4 + $0x5f0] sm:$0xff]  ;;  %v1113_v57 = vand.u32 2147483647, %v1833_v45 }
  0xef   :  { %985 = vmatpush.msrb.mxu3 %v956_v49  ;;  %890 = vmatpush.msrb.mxu0 %v1781_v59  ;;  %v960_v49 = vrot.slane %v2748_v31, 4  ;;  %v1815_v59 = vld [vmem:[%s3373_s4 + $0x568] sm:$0xff] }
  0xf0   :  { %910 = vmatpush.msrb.mxu1 %v1797_v61  ;;  %966 = vmatpush.msrb.mxu2 %v939_v60  ;;  %v1096_v60 = vand.u32 2147483647, %v1816_v54  ;;  %v1831_v61 = vld [vmem:[%s3373_s4 + $0x5e8] sm:$0xff] }
  0xf1   :  { %986 = vmatpush.msrb.mxu3 %v955_v63  ;;  %891 = vmatpush.msrb.mxu0 %v1780_v2  ;;  %v1112_v63 = vand.u32 2147483647, %v1832_v56  ;;  %v1814_v2 = vld [vmem:[%s3373_s4 + $0x560] sm:$0xff] }
  0xf2   :  { %911 = vmatpush.msrb.mxu1 %v1796_v6  ;;  %967 = vmatpush.msrb.mxu2 %v938_v4  ;;  %v1095_v4 = vand.u32 2147483647, %v1815_v59  ;;  %v1830_v6 = vld [vmem:[%s3373_s4 + $0x5e0] sm:$0xff] }
  0xf3   :  { %987 = vmatpush.msrb.mxu3 %v954_v0  ;;  %892 = vmatpush.msrb.mxu0 %v1779_v8  ;;  %v1111_v0 = vand.u32 2147483647, %v1831_v61  ;;  %v1813_v8 = vld [vmem:[%s3373_s4 + $0x558] sm:$0xff] }
  0xf4   :  { %912 = vmatpush.msrb.mxu1 %v1795_v10  ;;  %968 = vmatpush.msrb.mxu2 %v937_v1  ;;  %v1094_v1 = vand.u32 2147483647, %v1814_v2  ;;  %v1829_v10 = vld [vmem:[%s3373_s4 + $0x5d8] sm:$0xff] }
  0xf5   :  { %988 = vmatpush.msrb.mxu3 %v953_v3  ;;  %893 = vmatpush.msrb.mxu0 %v1778_v12  ;;  %v1110_v3 = vand.u32 2147483647, %v1830_v6  ;;  %v1812_v12 = vld [vmem:[%s3373_s4 + $0x550] sm:$0xff] }
  0xf6   :  { %913 = vmatpush.msrb.mxu1 %v1794_v5  ;;  %969 = vmatpush.msrb.mxu2 %v936_v58  ;;  %v1093_v58 = vand.u32 2147483647, %v1813_v8  ;;  %v1828_v5 = vld [vmem:[%s3373_s4 + $0x5d0] sm:$0xff] }
  0xf7   :  { %989 = vmatpush.msrb.mxu3 %v952_v14  ;;  %894 = vmatpush.msrb.mxu0 %v1777_v7  ;;  %v1109_v14 = vand.u32 2147483647, %v1829_v10  ;;  %v1811_v7 = vld [vmem:[%s3373_s4 + $0x548] sm:$0xff] }
  0xf8   :  { %914 = vmatpush.msrb.mxu1 %v1793_v16  ;;  %970 = vmatpush.msrb.mxu2 %v935_v62  ;;  %v1092_v62 = vand.u32 2147483647, %v1812_v12  ;;  %v1827_v16 = vld [vmem:[%s3373_s4 + $0x5c8] sm:$0xff] }
  0xf9   :  { %990 = vmatpush.msrb.mxu3 %v951_v9  ;;  %895 = vmatpush.msrb.mxu0 %v1776_v18  ;;  %v1108_v9 = vand.u32 2147483647, %v1828_v5  ;;  %v1810_v18 = vld [vmem:[%s3373_s4 + $0x540] sm:$0xff] }
  0xfa   :  { %915 = vmatpush.msrb.mxu1 %v1792_v20  ;;  %971 = vmatpush.msrb.mxu2 %v934_v11  ;;  %v1091_v11 = vand.u32 2147483647, %v1811_v7  ;;  %v1826_v20 = vld [vmem:[%s3373_s4 + $0x5c0] sm:$0xff] }
  0xfb   :  { %991 = vmatpush.msrb.mxu3 %v950_v13  ;;  %896 = vmatpush.msrb.mxu0 %v1775_v22  ;;  %v1107_v13 = vand.u32 2147483647, %v1827_v16  ;;  %v1809_v22 = vld [vmem:[%s3373_s4 + $0x538] sm:$0xff] }
  0xfc   :  { %916 = vmatpush.msrb.mxu1 %v1791_v26  ;;  %972 = vmatpush.msrb.mxu2 %v933_v24  ;;  %v1090_v24 = vand.u32 2147483647, %v1810_v18  ;;  %v1825_v26 = vld [vmem:[%s3373_s4 + $0x5b8] sm:$0xff] }
  0xfd   :  { %992 = vmatpush.msrb.mxu3 %v949_v19  ;;  %897 = vmatpush.msrb.mxu0 %v1774_v28  ;;  %v1106_v19 = vand.u32 2147483647, %v1826_v20  ;;  %v1808_v28 = vld [vmem:[%s3373_s4 + $0x530] sm:$0xff] }
  0xfe   :  { %917 = vmatpush.msrb.mxu1 %v1790_v30  ;;  %973 = vmatpush.msrb.mxu2 %v932_v21  ;;  %v1089_v21 = vand.u32 2147483647, %v1809_v22  ;;  %v1824_v30 = vld [vmem:[%s3373_s4 + $0x5b0] sm:$0xff] }
  0xff   :  { %993 = vmatpush.msrb.mxu3 %v948_v23  ;;  %898 = vmatpush.msrb.mxu0 %v1773_v32  ;;  %v1105_v23 = vand.u32 2147483647, %v1825_v26  ;;  %v1807_v32 = vld [vmem:[%s3373_s4 + $0x528] sm:$0xff] }
 0x100   :  { %918 = vmatpush.msrb.mxu1 %v1789_v34  ;;  %974 = vmatpush.msrb.mxu2 %v931_v25  ;;  %v1088_v25 = vand.u32 2147483647, %v1808_v28  ;;  %v1823_v34 = vld [vmem:[%s3373_s4 + $0x5a8] sm:$0xff] }
 0x101   :  { %994 = vmatpush.msrb.mxu3 %v947_v27  ;;  %899 = vmatpush.msrb.mxu0 %v1772_v36  ;;  %v1104_v27 = vand.u32 2147483647, %v1824_v30  ;;  %v1806_v36 = vld [vmem:[%s3373_s4 + $0x520] sm:$0xff] }
 0x102   :  { %919 = vmatpush.msrb.mxu1 %v1788_v40  ;;  %975 = vmatpush.msrb.mxu2 %v930_v38  ;;  %v1087_v38 = vand.u32 2147483647, %v1807_v32  ;;  %v1822_v40 = vld [vmem:[%s3373_s4 + $0x5a0] sm:$0xff] }
 0x103   :  { %995 = vmatpush.msrb.mxu3 %v946_v33  ;;  %900 = vmatpush.msrb.mxu0 %v1771_v42  ;;  %v1103_v33 = vand.u32 2147483647, %v1823_v34  ;;  %v1805_v42 = vld [vmem:[%s3373_s4 + $0x518] sm:$0xff] }
 0x104   :  { %920 = vmatpush.msrb.mxu1 %v1787_v44  ;;  %976 = vmatpush.msrb.mxu2 %v929_v35  ;;  %v1086_v35 = vand.u32 2147483647, %v1806_v36  ;;  %v1821_v44 = vld [vmem:[%s3373_s4 + $0x598] sm:$0xff] }
 0x105   :  { %996 = vmatpush.msrb.mxu3 %v945_v37  ;;  %901 = vmatpush.msrb.mxu0 %v1770_v39  ;;  %v1102_v37 = vand.u32 2147483647, %v1822_v40  ;;  %v1085_v39 = vand.u32 2147483647, %v1805_v42 }
 0x106   :  { %921 = vmatpush.msrb.mxu1 %v1786_v41  ;;  %977 = vmatpush.msrb.mxu2 %v928_v46  ;;  %v1804_v46 = vld [vmem:[%s3373_s4 + $0x510] sm:$0xff]  ;;  %v1101_v41 = vand.u32 2147483647, %v1821_v44 }
 0x107   :  { %997 = vmatpush.msrb.mxu3 %v944_v48  ;;  %902 = vmatmul.f32.vlgmr.msrb.gmra.mxu0 %v882_v43  ;;  %v1820_v48 = vld [vmem:[%s3373_s4 + $0x590] sm:$0xff]  ;;  %v1084_v43 = vand.u32 2147483647, %v1804_v46 }
 0x108   :  { %922 = vmatmul.f32.vlgmr.msrb.gmra.mxu1 %v883_v53  ;;  %1041 = vmatpush.msra.mxu0 %v1817_v51  ;;  %v1819_v51 = vld [vmem:[%s3373_s4 + $0x588] sm:$0xff] }
 0x109   :  { %1061 = vmatpush.msra.mxu1 %v1833_v45  ;;  %978 = vmatpush.msrb.mxu2 %v927_v50  ;;  %v1803_v50 = vld [vmem:[%s3373_s4 + $0x508] sm:$0xff]  ;;  %v1802_v45 = vld [vmem:[%s3373_s4 + $0x500] sm:$0xff] }
 0x10a   :  { %998 = vmatpush.msrb.mxu3 %v943_v52  ;;  %979 = vmatmul.f32.vlgmr.msrb.gmra.mxu2 %v959_v47  ;;  %v1100_v52 = vand.u32 2147483647, %v1820_v48  ;;  %v1083_v53 = vand.u32 2147483647, %v1803_v50  ;;  %v1082_v47 = vand.u32 2147483647, %v1802_v45 }
 0x10b   :  { %999 = vmatmul.f32.vlgmr.msrb.gmra.mxu3 %v960_v49  ;;  %1042 = vmatpush.msra.mxu0 %v1816_v54  ;;  %v1099_v54 = vand.u32 2147483647, %v1819_v51 }
 0x10c   :  { %1062 = vmatpush.msra.mxu1 %v1832_v56  ;;  %1118 = vmatpush.msra.mxu2 %v1097_v55  ;;  %v1818_v55 = vld [vmem:[%s3373_s4 + $0x580] sm:$0xff]  ;;  %v1037_v56 = vrot.slane %v2723_v15, 5 }
 0x10d   :  { %1138 = vmatpush.msra.mxu3 %v1113_v57  ;;  %1043 = vmatpush.msra.mxu0 %v1815_v59  ;;  %v1849_v57 = vld [vmem:[%s3373_s4 + $0x678] sm:$0xff]  ;;  %v1098_v49 = vand.u32 2147483647, %v1818_v55  ;;  %v1038_v59 = vrot.slane %v2728_v17, 5 }
 0x10e   :  { %1063 = vmatpush.msra.mxu1 %v1831_v61  ;;  %1119 = vmatpush.msra.mxu2 %v1096_v60  ;;  %v1865_v60 = vld [vmem:[%s3373_s4 + $0x6f8] sm:$0xff]  ;;  %v1848_v61 = vld [vmem:[%s3373_s4 + $0x670] sm:$0xff] }
 0x10f   :  { %1139 = vmatpush.msra.mxu3 %v1112_v63  ;;  %1044 = vmatpush.msra.mxu0 %v1814_v2  ;;  %v1252_v63 = vand.u32 2147483647, %v1849_v57  ;;  %v1114_v2 = vrot.slane %v2746_v29, 5 }
 0x110   :  { %1064 = vmatpush.msra.mxu1 %v1830_v6  ;;  %1120 = vmatpush.msra.mxu2 %v1095_v4  ;;  %v1864_v4 = vld [vmem:[%s3373_s4 + $0x6f0] sm:$0xff]  ;;  %v1268_v6 = vand.u32 2147483647, %v1865_v60 }
 0x111   :  { %1140 = vmatpush.msra.mxu3 %v1111_v0  ;;  %1045 = vmatpush.msra.mxu0 %v1813_v8  ;;  %v1115_v0 = vrot.slane %v2748_v31, 5  ;;  %v1847_v8 = vld [vmem:[%s3373_s4 + $0x668] sm:$0xff] }
 0x112   :  { %1065 = vmatpush.msra.mxu1 %v1829_v10  ;;  %1121 = vmatpush.msra.mxu2 %v1094_v1  ;;  %v1251_v1 = vand.u32 2147483647, %v1848_v61  ;;  %v1863_v10 = vld [vmem:[%s3373_s4 + $0x6e8] sm:$0xff] }
 0x113   :  { %1141 = vmatpush.msra.mxu3 %v1110_v3  ;;  %1046 = vmatpush.msra.mxu0 %v1812_v12  ;;  %v1267_v3 = vand.u32 2147483647, %v1864_v4  ;;  %v1846_v12 = vld [vmem:[%s3373_s4 + $0x660] sm:$0xff] }
 0x114   :  { %1066 = vmatpush.msra.mxu1 %v1828_v5  ;;  %1122 = vmatpush.msra.mxu2 %v1093_v58  ;;  %v1250_v58 = vand.u32 2147483647, %v1847_v8  ;;  %v1862_v5 = vld [vmem:[%s3373_s4 + $0x6e0] sm:$0xff] }
 0x115   :  { %1142 = vmatpush.msra.mxu3 %v1109_v14  ;;  %1047 = vmatpush.msra.mxu0 %v1811_v7  ;;  %v1266_v14 = vand.u32 2147483647, %v1863_v10  ;;  %v1845_v7 = vld [vmem:[%s3373_s4 + $0x658] sm:$0xff] }
 0x116   :  { %1067 = vmatpush.msra.mxu1 %v1827_v16  ;;  %1123 = vmatpush.msra.mxu2 %v1092_v62  ;;  %v1249_v62 = vand.u32 2147483647, %v1846_v12  ;;  %v1861_v16 = vld [vmem:[%s3373_s4 + $0x6d8] sm:$0xff] }
 0x117   :  { %1143 = vmatpush.msra.mxu3 %v1108_v9  ;;  %1048 = vmatpush.msra.mxu0 %v1810_v18  ;;  %v1265_v9 = vand.u32 2147483647, %v1862_v5  ;;  %v1844_v18 = vld [vmem:[%s3373_s4 + $0x650] sm:$0xff] }
 0x118   :  { %1068 = vmatpush.msra.mxu1 %v1826_v20  ;;  %1124 = vmatpush.msra.mxu2 %v1091_v11  ;;  %v1248_v11 = vand.u32 2147483647, %v1845_v7  ;;  %v1860_v20 = vld [vmem:[%s3373_s4 + $0x6d0] sm:$0xff] }
 0x119   :  { %1144 = vmatpush.msra.mxu3 %v1107_v13  ;;  %1049 = vmatpush.msra.mxu0 %v1809_v22  ;;  %v1264_v13 = vand.u32 2147483647, %v1861_v16  ;;  %v1843_v22 = vld [vmem:[%s3373_s4 + $0x648] sm:$0xff] }
 0x11a   :  { %1069 = vmatpush.msra.mxu1 %v1825_v26  ;;  %1125 = vmatpush.msra.mxu2 %v1090_v24  ;;  %v1247_v24 = vand.u32 2147483647, %v1844_v18  ;;  %v1859_v26 = vld [vmem:[%s3373_s4 + $0x6c8] sm:$0xff] }
 0x11b   :  { %1145 = vmatpush.msra.mxu3 %v1106_v19  ;;  %1050 = vmatpush.msra.mxu0 %v1808_v28  ;;  %v1263_v19 = vand.u32 2147483647, %v1860_v20  ;;  %v1842_v28 = vld [vmem:[%s3373_s4 + $0x640] sm:$0xff] }
 0x11c   :  { %1070 = vmatpush.msra.mxu1 %v1824_v30  ;;  %1126 = vmatpush.msra.mxu2 %v1089_v21  ;;  %v1246_v21 = vand.u32 2147483647, %v1843_v22  ;;  %v1858_v30 = vld [vmem:[%s3373_s4 + $0x6c0] sm:$0xff] }
 0x11d   :  { %1146 = vmatpush.msra.mxu3 %v1105_v23  ;;  %1051 = vmatpush.msra.mxu0 %v1807_v32  ;;  %v1262_v23 = vand.u32 2147483647, %v1859_v26  ;;  %v1841_v32 = vld [vmem:[%s3373_s4 + $0x638] sm:$0xff] }
 0x11e   :  { %1071 = vmatpush.msra.mxu1 %v1823_v34  ;;  %1127 = vmatpush.msra.mxu2 %v1088_v25  ;;  %v1245_v25 = vand.u32 2147483647, %v1842_v28  ;;  %v1857_v34 = vld [vmem:[%s3373_s4 + $0x6b8] sm:$0xff] }
 0x11f   :  { %1147 = vmatpush.msra.mxu3 %v1104_v27  ;;  %1052 = vmatpush.msra.mxu0 %v1806_v36  ;;  %v1261_v27 = vand.u32 2147483647, %v1858_v30  ;;  %v1840_v36 = vld [vmem:[%s3373_s4 + $0x630] sm:$0xff] }
 0x120   :  { %1072 = vmatpush.msra.mxu1 %v1822_v40  ;;  %1128 = vmatpush.msra.mxu2 %v1087_v38  ;;  %v1244_v38 = vand.u32 2147483647, %v1841_v32  ;;  %v1856_v40 = vld [vmem:[%s3373_s4 + $0x6b0] sm:$0xff] }
 0x121   :  { %1148 = vmatpush.msra.mxu3 %v1103_v33  ;;  %1053 = vmatpush.msra.mxu0 %v1805_v42  ;;  %v1260_v33 = vand.u32 2147483647, %v1857_v34  ;;  %v1839_v42 = vld [vmem:[%s3373_s4 + $0x628] sm:$0xff] }
 0x122   :  { %1073 = vmatpush.msra.mxu1 %v1821_v44  ;;  %1129 = vmatpush.msra.mxu2 %v1086_v35  ;;  %v1243_v35 = vand.u32 2147483647, %v1840_v36  ;;  %v1855_v44 = vld [vmem:[%s3373_s4 + $0x6a8] sm:$0xff] }
 0x123   :  { %1149 = vmatpush.msra.mxu3 %v1102_v37  ;;  %1054 = vmatpush.msra.mxu0 %v1804_v46  ;;  %v1259_v37 = vand.u32 2147483647, %v1856_v40  ;;  %v1838_v46 = vld [vmem:[%s3373_s4 + $0x620] sm:$0xff] }
 0x124   :  { %1074 = vmatpush.msra.mxu1 %v1820_v48  ;;  %1130 = vmatpush.msra.mxu2 %v1085_v39  ;;  %v1242_v39 = vand.u32 2147483647, %v1839_v42  ;;  %v1854_v48 = vld [vmem:[%s3373_s4 + $0x6a0] sm:$0xff] }
 0x125   :  { %1150 = vmatpush.msra.mxu3 %v1101_v41  ;;  %1055 = vmatpush.msra.mxu0 %v1803_v50  ;;  %v1258_v41 = vand.u32 2147483647, %v1855_v44  ;;  %v1837_v50 = vld [vmem:[%s3373_s4 + $0x618] sm:$0xff] }
 0x126   :  { %1075 = vmatpush.msra.mxu1 %v1819_v51  ;;  %1131 = vmatpush.msra.mxu2 %v1084_v43  ;;  %v1241_v43 = vand.u32 2147483647, %v1838_v46  ;;  %v1853_v51 = vld [vmem:[%s3373_s4 + $0x698] sm:$0xff] }
 0x127   :  { %1151 = vmatpush.msra.mxu3 %v1100_v52  ;;  %1056 = vmatpush.msra.mxu0 %v1802_v45  ;;  %v1257_v52 = vand.u32 2147483647, %v1854_v48  ;;  %v1240_v45 = vand.u32 2147483647, %v1837_v50 }
 0x128   :  { %1076 = vmatpush.msra.mxu1 %v1818_v55  ;;  %1132 = vmatpush.msra.mxu2 %v1083_v53  ;;  %v1836_v53 = vld [vmem:[%s3373_s4 + $0x610] sm:$0xff]  ;;  %v1256_v55 = vand.u32 2147483647, %v1853_v51 }
 0x129   :  { %1152 = vmatpush.msra.mxu3 %v1099_v54  ;;  %1057 = vmatmul.f32.vlgmr.msra.gmra.mxu0 %v1037_v56  ;;  %v1852_v54 = vld [vmem:[%s3373_s4 + $0x690] sm:$0xff]  ;;  %v1239_v56 = vand.u32 2147483647, %v1836_v53 }
 0x12a   :  { %1077 = vmatmul.f32.vlgmr.msra.gmra.mxu1 %v1038_v59  ;;  %1196 = vmatpush.msrb.mxu0 %v1849_v57  ;;  %v1851_v57 = vld [vmem:[%s3373_s4 + $0x688] sm:$0xff] }
 0x12b   :  { %1216 = vmatpush.msrb.mxu1 %v1865_v60  ;;  %1133 = vmatpush.msra.mxu2 %v1082_v47  ;;  %v1835_v47 = vld [vmem:[%s3373_s4 + $0x608] sm:$0xff]  ;;  %v1834_v60 = vld [vmem:[%s3373_s4 + $0x600] sm:$0xff] }
 0x12c   :  { %1153 = vmatpush.msra.mxu3 %v1098_v49  ;;  %1134 = vmatmul.f32.vlgmr.msra.gmra.mxu2 %v1114_v2  ;;  %v1255_v49 = vand.u32 2147483647, %v1852_v54  ;;  %v1238_v59 = vand.u32 2147483647, %v1835_v47  ;;  %v1237_v2 = vand.u32 2147483647, %v1834_v60 }
 0x12d   :  { %1154 = vmatmul.f32.vlgmr.msra.gmra.mxu3 %v1115_v0  ;;  %1197 = vmatpush.msrb.mxu0 %v1848_v61  ;;  %v1254_v61 = vand.u32 2147483647, %v1851_v57 }
 0x12e   :  { %1217 = vmatpush.msrb.mxu1 %v1864_v4  ;;  %1273 = vmatpush.msrb.mxu2 %v1252_v63  ;;  %v1850_v63 = vld [vmem:[%s3373_s4 + $0x680] sm:$0xff]  ;;  %v1192_v4 = vrot.slane %v2723_v15, 6 }
 0x12f   :  { %1293 = vmatpush.msrb.mxu3 %v1268_v6  ;;  %1198 = vmatpush.msrb.mxu0 %v1847_v8  ;;  %v1881_v6 = vld [vmem:[%s3373_s4 + $0x778] sm:$0xff]  ;;  %v1253_v0 = vand.u32 2147483647, %v1850_v63  ;;  %v1193_v8 = vrot.slane %v2728_v17, 6 }
 0x130   :  { %1218 = vmatpush.msrb.mxu1 %v1863_v10  ;;  %1274 = vmatpush.msrb.mxu2 %v1251_v1  ;;  %v1897_v1 = vld [vmem:[%s3373_s4 + $0x7f8] sm:$0xff]  ;;  %v1880_v10 = vld [vmem:[%s3373_s4 + $0x770] sm:$0xff] }
 0x131   :  { %1294 = vmatpush.msrb.mxu3 %v1267_v3  ;;  %1199 = vmatpush.msrb.mxu0 %v1846_v12  ;;  %v1407_v3 = vand.u32 2147483647, %v1881_v6  ;;  %v1269_v12 = vrot.slane %v2746_v29, 6 }
 0x132   :  { %1219 = vmatpush.msrb.mxu1 %v1862_v5  ;;  %1275 = vmatpush.msrb.mxu2 %v1250_v58  ;;  %v1896_v58 = vld [vmem:[%s3373_s4 + $0x7f0] sm:$0xff]  ;;  %v1423_v5 = vand.u32 2147483647, %v1897_v1 }
 0x133   :  { %1295 = vmatpush.msrb.mxu3 %v1266_v14  ;;  %1200 = vmatpush.msrb.mxu0 %v1845_v7  ;;  %v1270_v14 = vrot.slane %v2748_v31, 6  ;;  %v1879_v7 = vld [vmem:[%s3373_s4 + $0x768] sm:$0xff] }
 0x134   :  { %1220 = vmatpush.msrb.mxu1 %v1861_v16  ;;  %1276 = vmatpush.msrb.mxu2 %v1249_v62  ;;  %v1406_v62 = vand.u32 2147483647, %v1880_v10  ;;  %v1895_v16 = vld [vmem:[%s3373_s4 + $0x7e8] sm:$0xff] }
 0x135   :  { %1296 = vmatpush.msrb.mxu3 %v1265_v9  ;;  %1201 = vmatpush.msrb.mxu0 %v1844_v18  ;;  %v1422_v9 = vand.u32 2147483647, %v1896_v58  ;;  %v1878_v18 = vld [vmem:[%s3373_s4 + $0x760] sm:$0xff] }
 0x136   :  { %1221 = vmatpush.msrb.mxu1 %v1860_v20  ;;  %1277 = vmatpush.msrb.mxu2 %v1248_v11  ;;  %v1405_v11 = vand.u32 2147483647, %v1879_v7  ;;  %v1894_v20 = vld [vmem:[%s3373_s4 + $0x7e0] sm:$0xff] }
 0x137   :  { %1297 = vmatpush.msrb.mxu3 %v1264_v13  ;;  %1202 = vmatpush.msrb.mxu0 %v1843_v22  ;;  %v1421_v13 = vand.u32 2147483647, %v1895_v16  ;;  %v1877_v22 = vld [vmem:[%s3373_s4 + $0x758] sm:$0xff] }
 0x138   :  { %1222 = vmatpush.msrb.mxu1 %v1859_v26  ;;  %1278 = vmatpush.msrb.mxu2 %v1247_v24  ;;  %v1404_v24 = vand.u32 2147483647, %v1878_v18  ;;  %v1893_v26 = vld [vmem:[%s3373_s4 + $0x7d8] sm:$0xff] }
 0x139   :  { %1298 = vmatpush.msrb.mxu3 %v1263_v19  ;;  %1203 = vmatpush.msrb.mxu0 %v1842_v28  ;;  %v1420_v19 = vand.u32 2147483647, %v1894_v20  ;;  %v1876_v28 = vld [vmem:[%s3373_s4 + $0x750] sm:$0xff] }
 0x13a   :  { %1223 = vmatpush.msrb.mxu1 %v1858_v30  ;;  %1279 = vmatpush.msrb.mxu2 %v1246_v21  ;;  %v1403_v21 = vand.u32 2147483647, %v1877_v22  ;;  %v1892_v30 = vld [vmem:[%s3373_s4 + $0x7d0] sm:$0xff] }
 0x13b   :  { %1299 = vmatpush.msrb.mxu3 %v1262_v23  ;;  %1204 = vmatpush.msrb.mxu0 %v1841_v32  ;;  %v1419_v23 = vand.u32 2147483647, %v1893_v26  ;;  %v1875_v32 = vld [vmem:[%s3373_s4 + $0x748] sm:$0xff] }
 0x13c   :  { %1224 = vmatpush.msrb.mxu1 %v1857_v34  ;;  %1280 = vmatpush.msrb.mxu2 %v1245_v25  ;;  %v1402_v25 = vand.u32 2147483647, %v1876_v28  ;;  %v1891_v34 = vld [vmem:[%s3373_s4 + $0x7c8] sm:$0xff] }
 0x13d   :  { %1300 = vmatpush.msrb.mxu3 %v1261_v27  ;;  %1205 = vmatpush.msrb.mxu0 %v1840_v36  ;;  %v1418_v27 = vand.u32 2147483647, %v1892_v30  ;;  %v1874_v36 = vld [vmem:[%s3373_s4 + $0x740] sm:$0xff] }
 0x13e   :  { %1225 = vmatpush.msrb.mxu1 %v1856_v40  ;;  %1281 = vmatpush.msrb.mxu2 %v1244_v38  ;;  %v1401_v38 = vand.u32 2147483647, %v1875_v32  ;;  %v1890_v40 = vld [vmem:[%s3373_s4 + $0x7c0] sm:$0xff] }
 0x13f   :  { %1301 = vmatpush.msrb.mxu3 %v1260_v33  ;;  %1206 = vmatpush.msrb.mxu0 %v1839_v42  ;;  %v1417_v33 = vand.u32 2147483647, %v1891_v34  ;;  %v1873_v42 = vld [vmem:[%s3373_s4 + $0x738] sm:$0xff] }
 0x140   :  { %1226 = vmatpush.msrb.mxu1 %v1855_v44  ;;  %1282 = vmatpush.msrb.mxu2 %v1243_v35  ;;  %v1400_v35 = vand.u32 2147483647, %v1874_v36  ;;  %v1889_v44 = vld [vmem:[%s3373_s4 + $0x7b8] sm:$0xff] }
 0x141   :  { %1302 = vmatpush.msrb.mxu3 %v1259_v37  ;;  %1207 = vmatpush.msrb.mxu0 %v1838_v46  ;;  %v1416_v37 = vand.u32 2147483647, %v1890_v40  ;;  %v1872_v46 = vld [vmem:[%s3373_s4 + $0x730] sm:$0xff] }
 0x142   :  { %1227 = vmatpush.msrb.mxu1 %v1854_v48  ;;  %1283 = vmatpush.msrb.mxu2 %v1242_v39  ;;  %v1399_v39 = vand.u32 2147483647, %v1873_v42  ;;  %v1888_v48 = vld [vmem:[%s3373_s4 + $0x7b0] sm:$0xff] }
 0x143   :  { %1303 = vmatpush.msrb.mxu3 %v1258_v41  ;;  %1208 = vmatpush.msrb.mxu0 %v1837_v50  ;;  %v1415_v41 = vand.u32 2147483647, %v1889_v44  ;;  %v1871_v50 = vld [vmem:[%s3373_s4 + $0x728] sm:$0xff] }
 0x144   :  { %1228 = vmatpush.msrb.mxu1 %v1853_v51  ;;  %1284 = vmatpush.msrb.mxu2 %v1241_v43  ;;  %v1398_v43 = vand.u32 2147483647, %v1872_v46  ;;  %v1887_v51 = vld [vmem:[%s3373_s4 + $0x7a8] sm:$0xff] }
 0x145   :  { %1304 = vmatpush.msrb.mxu3 %v1257_v52  ;;  %1209 = vmatpush.msrb.mxu0 %v1836_v53  ;;  %v1414_v52 = vand.u32 2147483647, %v1888_v48  ;;  %v1870_v53 = vld [vmem:[%s3373_s4 + $0x720] sm:$0xff] }
 0x146   :  { %1229 = vmatpush.msrb.mxu1 %v1852_v54  ;;  %1285 = vmatpush.msrb.mxu2 %v1240_v45  ;;  %v1397_v45 = vand.u32 2147483647, %v1871_v50  ;;  %v1886_v54 = vld [vmem:[%s3373_s4 + $0x7a0] sm:$0xff] }
 0x147   :  { %1305 = vmatpush.msrb.mxu3 %v1256_v55  ;;  %1210 = vmatpush.msrb.mxu0 %v1835_v47  ;;  %v1413_v55 = vand.u32 2147483647, %v1887_v51  ;;  %v1869_v47 = vld [vmem:[%s3373_s4 + $0x718] sm:$0xff] }
 0x148   :  { %1230 = vmatpush.msrb.mxu1 %v1851_v57  ;;  %1286 = vmatpush.msrb.mxu2 %v1239_v56  ;;  %v1396_v56 = vand.u32 2147483647, %v1870_v53  ;;  %v1885_v57 = vld [vmem:[%s3373_s4 + $0x798] sm:$0xff] }
 0x149   :  { %1306 = vmatpush.msrb.mxu3 %v1255_v49  ;;  %1211 = vmatpush.msrb.mxu0 %v1834_v60  ;;  %v1412_v49 = vand.u32 2147483647, %v1886_v54  ;;  %v1395_v60 = vand.u32 2147483647, %v1869_v47 }
 0x14a   :  { %1231 = vmatpush.msrb.mxu1 %v1850_v63  ;;  %1287 = vmatpush.msrb.mxu2 %v1238_v59  ;;  %v1868_v59 = vld [vmem:[%s3373_s4 + $0x710] sm:$0xff]  ;;  %v1411_v63 = vand.u32 2147483647, %v1885_v57 }
 0x14b   :  { %1307 = vmatpush.msrb.mxu3 %v1254_v61  ;;  %1212 = vmatmul.f32.vlgmr.msrb.gmra.mxu0 %v1192_v4  ;;  %v1884_v61 = vld [vmem:[%s3373_s4 + $0x790] sm:$0xff]  ;;  %v1394_v4 = vand.u32 2147483647, %v1868_v59 }
 0x14c   :  { %1232 = vmatmul.f32.vlgmr.msrb.gmra.mxu1 %v1193_v8  ;;  %1351 = vmatpush.msra.mxu0 %v1881_v6  ;;  %v1883_v6 = vld [vmem:[%s3373_s4 + $0x788] sm:$0xff]  ;;  %v1866_v8 = vld [vmem:[%s3373_s4 + $0x700] sm:$0xff] }
 0x14d   :  { %1371 = vmatpush.msra.mxu1 %v1897_v1  ;;  %1288 = vmatpush.msrb.mxu2 %v1237_v2  ;;  %v1867_v2 = vld [vmem:[%s3373_s4 + $0x708] sm:$0xff] }
 0x14e   :  { %1308 = vmatpush.msrb.mxu3 %v1253_v0  ;;  %1289 = vmatmul.f32.vlgmr.msrb.gmra.mxu2 %v1269_v12  ;;  %v1410_v0 = vand.u32 2147483647, %v1884_v61  ;;  %v1393_v1 = vand.u32 2147483647, %v1867_v2  ;;  %v1392_v12 = vand.u32 2147483647, %v1866_v8 }
 0x14f   :  { %1309 = vmatmul.f32.vlgmr.msrb.gmra.mxu3 %v1270_v14  ;;  %1352 = vmatpush.msra.mxu0 %v1880_v10  ;;  %v1882_v10 = vld [vmem:[%s3373_s4 + $0x780] sm:$0xff]  ;;  %v1348_v14 = vrot.slane %v2728_v17, 7 }
 0x150   :  { %1372 = vmatpush.msra.mxu1 %v1896_v58  ;;  %1428 = vmatpush.msra.mxu2 %v1407_v3  ;;  %v1409_v3 = vand.u32 2147483647, %v1883_v6  ;;  %v1408_v58 = vand.u32 2147483647, %v1882_v10 }
 0x151   :  { %1448 = vmatpush.msra.mxu3 %v1423_v5  ;;  %1353 = vmatpush.msra.mxu0 %v1879_v7  ;;  %v1347_v5 = vrot.slane %v2723_v15, 7  ;;  %v1424_v7 = vrot.slane %v2746_v29, 7 }
 0x152   :  { %1373 = vmatpush.msra.mxu1 %v1895_v16  ;;  %1429 = vmatpush.msra.mxu2 %v1406_v62  ;;  %v1425_v62 = vrot.slane %v2748_v31, 7  ;;  %v285_v16 = vpop.f32.mrf.mxu0 }
 0x153   :  { %1449 = vmatpush.msra.mxu3 %v1422_v9  ;;  %1354 = vmatpush.msra.mxu0 %v1878_v18  ;;  %v305_v9 = vpop.f32.mrf.mxu1  ;;  %v397_v18 = vpop.f32.mrf.mxu2 }
 0x154   :  { %1374 = vmatpush.msra.mxu1 %v1894_v20  ;;  %1430 = vmatpush.msra.mxu2 %v1405_v11  ;;  %v417_v11 = vpop.f32.mrf.mxu3 }
 0x155   :  { %1450 = vmatpush.msra.mxu3 %v1421_v13  ;;  %1355 = vmatpush.msra.mxu0 %v1877_v22 }
 0x156   :  { %1375 = vmatpush.msra.mxu1 %v1893_v26  ;;  %1431 = vmatpush.msra.mxu2 %v1404_v24 }
 0x157   :  { %1451 = vmatpush.msra.mxu3 %v1420_v19  ;;  %1356 = vmatpush.msra.mxu0 %v1876_v28 }
 0x158   :  { %1376 = vmatpush.msra.mxu1 %v1892_v30  ;;  %1432 = vmatpush.msra.mxu2 %v1403_v21 }
 0x159   :  { %1452 = vmatpush.msra.mxu3 %v1419_v23  ;;  %1357 = vmatpush.msra.mxu0 %v1875_v32  ;;  %v1479_v32 = vld [vmem:[%s3375_s6 + $0x8] sm:$0x3] }
 0x15a   :  { %1377 = vmatpush.msra.mxu1 %v1891_v34  ;;  %1433 = vmatpush.msra.mxu2 %v1402_v25  ;;  %v476_v15 = vpop.f32.mrf.mxu0  ;;  %v1509_v25 = vand.u32 2147483647, %v1479_v32 }
 0x15b   :  { %1453 = vmatpush.msra.mxu3 %v1418_v27  ;;  %1358 = vmatpush.msra.mxu0 %v1874_v36  ;;  %v496_v20 = vpop.f32.mrf.mxu1  ;;  %v516_v13 = vpop.f32.mrf.mxu2  ;;  %v1478_v27 = vld [vmem:[%s3375_s6] sm:$0xff] }
 0x15c   :  { %1378 = vmatpush.msra.mxu1 %v1890_v40  ;;  %1434 = vmatpush.msra.mxu2 %v1401_v38  ;;  %v536_v22 = vpop.f32.mrf.mxu3  ;;  %v1508_v38 = vand.u32 2147483647, %v1478_v27 }
 0x15d   :  { %1454 = vmatpush.msra.mxu3 %v1417_v33  ;;  %1359 = vmatpush.msra.mxu0 %v1873_v42 }
 0x15e   :  { %1379 = vmatpush.msra.mxu1 %v1889_v44  ;;  %1435 = vmatpush.msra.mxu2 %v1400_v35  ;;  %v306_v44 = vadd.f32 %v305_v9, %v285_v16 }
 0x15f   :  { %1455 = vmatpush.msra.mxu3 %v1416_v37  ;;  %1360 = vmatpush.msra.mxu0 %v1872_v46  ;;  %v497_v37 = vadd.f32 %v496_v20, %v476_v15  ;;  %v235_v46 = vld [vmem:[%s3374_s5] sm:$0x1]  ;;  %s2115_s5 = smov [#allocation4]  }
 0x160   :  { %1380 = vmatpush.msra.mxu1 %v1888_v48  ;;  %1436 = vmatpush.msra.mxu2 %v1399_v39  ;;  %v418_v39 = vadd.f32 %v417_v11, %v397_v18  ;;  %s1557_s6 = sshll.u32 %s2115_s5, 4  ;;  %s1590_s5 = sshll.u32 %s2120_s21, 4  ;;  %s1558_s6 = int_to_ptr.vmem [resolvable:$true] %s1557_s6  ;;  %s1591_s5 = int_to_ptr.vmem [resolvable:$true] %s1590_s5 }
 0x161   :  { %1456 = vmatpush.msra.mxu3 %v1415_v41  ;;  %1361 = vmatpush.msra.mxu0 %v1871_v50  ;;  %v517_v48 = vadd.f32 %v516_v13, %v497_v37  ;;  %1562 = dma.vmem_to_hbm [thread:$0]  %s1558_s6, 256, %s1560_s1, [#allocation5]  }
 0x162   :  { %1381 = vmatpush.msra.mxu1 %v1887_v51  ;;  %1437 = vmatpush.msra.mxu2 %v1398_v43  ;;  %v593_v17 = vpop.f32.mrf.mxu0  ;;  %v308_v43 = vadd.f32 %v306_v44, %v235_v46  ;;  %1573 = dma.vmem_to_hbm [thread:$0]  %s1569_s12, 256, %s1571_s19, [#allocation5]  }
 0x163   :  { %1457 = vmatpush.msra.mxu3 %v1414_v52  ;;  %1362 = vmatpush.msra.mxu0 %v1870_v53  ;;  %v613_v24 = vpop.f32.mrf.mxu1  ;;  %v670_v26 = vpop.f32.mrf.mxu2  ;;  %s1612_s1 = sshll.u32 %s2121_s7, 4  ;;  %s1613_s1 = int_to_ptr.vmem [resolvable:$true] %s1612_s1 }
 0x164   :  { %1382 = vmatpush.msra.mxu1 %v1886_v54  ;;  %1438 = vmatpush.msra.mxu2 %v1397_v45  ;;  %v690_v19 = vpop.f32.mrf.mxu3  ;;  %v614_v51 = vadd.f32 %v613_v24, %v593_v17  ;;  %v420_v53 = vadd.f32 %v418_v39, %v308_v43  ;;  %v537_v45 = vadd.f32 %v536_v22, %v517_v48 }
 0x165   :  { %1458 = vmatpush.msra.mxu3 %v1413_v55  ;;  %1363 = vmatpush.msra.mxu0 %v1869_v47  ;;  %v691_v52 = vadd.f32 %v690_v19, %v670_v26 }
 0x166   :  { %1383 = vmatpush.msra.mxu1 %v1885_v57  ;;  %1439 = vmatpush.msra.mxu2 %v1396_v56  ;;  %v616_v57 = vadd.f32 %v614_v51, %v420_v53 }
 0x167   :  { %1459 = vmatpush.msra.mxu3 %v1412_v49  ;;  %1364 = vmatpush.msra.mxu0 %v1868_v59  ;;  %v693_v49 = vadd.f32 %v691_v52, %v537_v45 }
 0x168   :  { %1384 = vmatpush.msra.mxu1 %v1884_v61  ;;  %1440 = vmatpush.msra.mxu2 %v1395_v60 }
 0x169   :  { %1460 = vmatpush.msra.mxu3 %v1411_v63  ;;  %1365 = vmatpush.msra.mxu0 %v1867_v2 }
 0x16a   :  { %1385 = vmatpush.msra.mxu1 %v1883_v6  ;;  %1441 = vmatpush.msra.mxu2 %v1394_v4  ;;  %v748_v29 = vpop.f32.mrf.mxu0 }
 0x16b   :  { %1461 = vmatpush.msra.mxu3 %v1410_v0  ;;  %1366 = vmatpush.msra.mxu0 %v1866_v8  ;;  %v768_v28 = vpop.f32.mrf.mxu1  ;;  %v825_v21 = vpop.f32.mrf.mxu2 }
 0x16c   :  { %1386 = vmatpush.msra.mxu1 %v1882_v10  ;;  %1442 = vmatpush.msra.mxu2 %v1393_v1  ;;  %v845_v30 = vpop.f32.mrf.mxu3  ;;  %v769_v54 = vadd.f32 %v768_v28, %v748_v29 }
 0x16d   :  { %1462 = vmatpush.msra.mxu3 %v1409_v3  ;;  %1367 = vmatmul.f32.vlgmr.msra.gmra.mxu0 %v1347_v5  ;;  %v846_v55 = vadd.f32 %v845_v30, %v825_v21 }
 0x16e   :  { %1387 = vmatmul.f32.vlgmr.msra.gmra.mxu1 %v1348_v14  ;;  %1443 = vmatpush.msra.mxu2 %v1392_v12  ;;  %v771_v61 = vadd.f32 %v769_v54, %v616_v57 }
 0x16f   :  { %1463 = vmatpush.msra.mxu3 %v1408_v58  ;;  %1444 = vmatmul.f32.vlgmr.msra.gmra.mxu2 %v1424_v7  ;;  %v848_v63 = vadd.f32 %v846_v55, %v693_v49 }
 0x170   :  { %1464 = vmatmul.f32.vlgmr.msra.gmra.mxu3 %v1425_v62  ;;  %1898 = vmatpush.msk.msrb.mxu0 %vm1484_vm2, %v1479_v32 }
 0x171   :  { %1900 = vmatpush.msk.msrb.mxu1 %vm1484_vm2, %v1509_v25 }
 0x172   :  { %1503 = vmatpush.msrb.mxu0 %v1478_v27 }
 0x173   :  { %1531 = vmatpush.msrb.mxu1 %v1508_v38 }
 0x184   :  { %v903_v31 = vpop.f32.mrf.mxu0 }
 0x185   :  { %v923_v23 = vpop.f32.mrf.mxu1 }
 0x186   :  { %v924_v59 = vadd.f32 %v923_v23, %v903_v31 }
 0x188   :  { %v926_v8 = vadd.f32 %v924_v59, %v771_v61 }
 0x18d   :  { %v980_v34 = vpop.f32.mrf.mxu2 }
 0x18e   :  { %v1000_v36 = vpop.f32.mrf.mxu3 }
 0x18f   :  { %v1001_v60 = vadd.f32 %v1000_v36, %v980_v34 }
 0x191   :  { %v1003_v1 = vadd.f32 %v1001_v60, %v848_v63 }
 0x1a6   :  { %v1058_v40 = vpop.f32.mrf.mxu0 }
 0x1a7   :  { %v1078_v33 = vpop.f32.mrf.mxu1 }
 0x1a8   :  { %v1079_v2 = vadd.f32 %v1078_v33, %v1058_v40 }
 0x1aa   :  { %v1081_v12 = vadd.f32 %v1079_v2, %v926_v8 }
 0x1af   :  { %v1135_v42 = vpop.f32.mrf.mxu2 }
 0x1b0   :  { %v1155_v35 = vpop.f32.mrf.mxu3 }
 0x1b1   :  { %v1156_v4 = vadd.f32 %v1155_v35, %v1135_v42 }
 0x1b3   :  { %v1158_v58 = vadd.f32 %v1156_v4, %v1003_v1 }
 0x1c8   :  { %v1213_v41 = vpop.f32.mrf.mxu0 }
 0x1c9   :  { %v1233_v50 = vpop.f32.mrf.mxu1 }
 0x1ca   :  { %v1234_v10 = vadd.f32 %v1233_v50, %v1213_v41 }
 0x1cc   :  { %v1236_v62 = vadd.f32 %v1234_v10, %v1081_v12 }
 0x1d1   :  { %v1290_v47 = vpop.f32.mrf.mxu2 }
 0x1d2   :  { %v1310_v56 = vpop.f32.mrf.mxu3 }
 0x1d3   :  { %v1311_v3 = vadd.f32 %v1310_v56, %v1290_v47 }
 0x1d5   :  { %v1313_v16 = vadd.f32 %v1311_v3, %v1158_v58 }
 0x1ea   :  { %v1368_v6 = vpop.f32.mrf.mxu0 }
 0x1eb   :  { %v1388_v0 = vpop.f32.mrf.mxu1 }
 0x1ec   :  { %v1389_v5 = vadd.f32 %v1388_v0, %v1368_v6 }
 0x1ee   :  { %v1391_v18 = vadd.f32 %v1389_v5, %v1236_v62 }
 0x1f2   :  { %v1445_v14 = vpop.f32.mrf.mxu2 }
 0x1f3   :  { %v1465_v7 = vpop.f32.mrf.mxu3 }
 0x1f4   :  { %v1466_v9 = vadd.f32 %v1465_v7, %v1445_v14 }
 0x1f6   :  { %v1468_v11 = vadd.f32 %v1466_v9, %v1313_v16 }
 0x1f8   :  { %v1469_v15 = vsub.f32 %v1391_v18, %v1468_v11  ;;  %v1470_v20 = vadd.f32 %v1468_v11, %v1391_v18 }
 0x1fa   :  { %v1474_v13 = vadd.f32 %v1470_v20, %v1469_v15  ;;  %v1476_v22 = vsub.f32 %v1470_v20, %v1469_v15  ;;  %1473 = vst.msk [vmem:[#allocation10] sm:$0x1] %vm1471_vm3, %v1470_v20 }
 0x1fb   :  { %1472 = vst.msk [vmem:[#allocation9] sm:$0x1] %vm1471_vm3, %v1469_v15  ;;  %1606 = dma.vmem_to_hbm [thread:$0]  %s1602_s8, 16, %s1604_s28, [#allocation11]  }
 0x1fc   :  { %v1475_v17 = vmul.f32 0.5, %v1474_v13  ;;  %v1477_v24 = vmul.f32 0.5, %v1476_v22  ;;  %1595 = dma.vmem_to_hbm [thread:$0]  %s1591_s5, 16, %s1593_s0, [#allocation8]  }
 0x1fe   :  { %1899 = vmatmul.msk.f32.vlgmr.msrb.gmra.mxu0 %vm1480_vm4, %v1475_v17  ;;  %1901 = vmatmul.msk.f32.vlgmr.msrb.gmra.mxu1 %vm1480_vm4, %v1477_v24 }
 0x27b   :  { %v1505_v26 = vpop.f32.mrf.mxu0  ;;  %v1533_v19 = vpop.f32.mrf.mxu1 }
 0x27c   :  { %v1536_v29 = vsub.f32 %v1505_v26, %v1533_v19  ;;  %v1539_v28 = vadd.f32 %v1533_v19, %v1505_v26 }
 0x27e   :  { %1538 = vst.msk [vmem:[#allocation12] sm:$0x1] %vm1537_vm5, %v1536_v29 }
 0x27f   :  { %1540 = vst.msk [vmem:[#allocation13] sm:$0x1] %vm1537_vm5, %v1539_v28  ;;  %1617 = dma.vmem_to_hbm [thread:$0]  %s1613_s1, 16, %s1615_s9, [#allocation11]  }
 0x280   :  { %1628 = dma.vmem_to_hbm [thread:$0]  %s1624_s25, 16, %s1626_s27, [#allocation14]  }
 0x281   :  { %2104 = dma.done.wait [#allocation3], 256  }
 0x282   :  { %2105 = vsyncadd [#allocation3], 4294967040 }
 0x283   :  { %2106 = dma.done.wait [#allocation5], 512  }
 0x284   :  { %2107 = vsyncadd [#allocation5], 4294966784 }
 0x285   :  { %2108 = dma.done.wait [#allocation8], 272  }
 0x286   :  { %2109 = vsyncadd [#allocation8], 4294967024 }
 0x287   :  { %2110 = dma.done.wait [#allocation11], 32  }
 0x288   :  { %2111 = vsyncadd [#allocation11], 4294967264 }
 0x289   :  { %2112 = dma.done.wait [#allocation14], 16  }
 0x28a   :  { %2113 = vsyncadd [#allocation14], 4294967280 }
 0x28b   :  { %1661 = vsyncpa [#allocation3], 1 }
 0x28c   :  { %1662 = vsyncpa [#allocation5], 1 }
 0x28d   :  { %1663 = vsyncpa [#allocation8], 1 }
 0x28e   :  { %1664 = vsyncpa [#allocation11], 1 }
 0x28f   :  { %1665 = vsyncpa [#allocation14], 1 }

</bundles_post_ra>
